<compile_context>
chip_gen: v7x
topology: tpu7x:2x2x1
jax: 0.10.0
libtpu: 0.0.40
codegen_flags: <defaults>
</compile_context>

<pallas_src>
import math
from functools import partial

import jax
import jax.numpy as jnp
from jax.experimental import pallas as pl
from jax.experimental.pallas import tpu as pltpu


def _layer_norm(x, gamma, beta, eps=1e-5):
    # f32 statistics, matches nn.LayerNorm defaults.
    mu = jnp.mean(x, axis=-1, keepdims=True)
    var = jnp.mean((x - mu) ** 2, axis=-1, keepdims=True)
    return (x - mu) * jax.lax.rsqrt(var + eps) * gamma + beta


# ----------------------------------------------------------------------------
# Fused whole-model kernel: num_layers x TransformerBlock + avg-pool + MLP head.
# One grid step == one tile of Bt batch elements.
# ----------------------------------------------------------------------------
def fused_tst_kernel(x_ref, qkvw_ref, qkvb_ref, wo_ref, ffw_ref, vec_ref,
                     hw1_ref, hvec_ref, o_ref, *, num_layers, num_heads):
    Bt, S, E = x_ref.shape
    H = num_heads
    dh = E // H
    M = Bt * S
    mmt = qkvw_ref.dtype                        # matmul input dtype (bf16)

    # (Bt,S,E) -> (Bt*S, E): all position-wise ops run on one tall lane-dense tile.
    x = x_ref[...].reshape(M, E).astype(jnp.float32)

    # Static unroll over layers (num_layers small); weights indexed statically.
    for l in range(num_layers):
        # ---- fused QKV projection (softmax scale already folded into Q cols) ----
        qkv = jnp.dot(x.astype(mmt), qkvw_ref[l],
                      preferred_element_type=jnp.float32) + qkvb_ref[l]   # (M, 3E)
        qkv_bf = qkv.astype(mmt)                # one cast reused by every head

        # ---- attention: batched over Bt, short static unroll over heads ----
        ctx_heads = []
        for h in range(H):
            q = qkv_bf[:, h * dh:(h + 1) * dh].reshape(Bt, S, dh)
            k = qkv_bf[:, E + h * dh:E + (h + 1) * dh].reshape(Bt, S, dh)
            v = qkv_bf[:, 2 * E + h * dh:2 * E + (h + 1) * dh].reshape(Bt, S, dh)
            s = jnp.einsum("bqd,bkd->bqk", q, k,
                           preferred_element_type=jnp.float32)            # (Bt,S,S)
            s = s - jnp.max(s, axis=-1, keepdims=True)
            p = jnp.exp(s)
            p = p * pl.reciprocal(jnp.sum(p, axis=-1, keepdims=True), approx=True)
            ctx = jnp.einsum("bqk,bkd->bqd", p.astype(mmt), v,
                             preferred_element_type=jnp.float32)          # (Bt,S,dh)
            ctx_heads.append(ctx.reshape(M, dh))
        ctx_cat = jnp.concatenate(ctx_heads, axis=-1)                     # (M, E)

        # ---- out-projection: one matmul on the lane-concatenated heads ----
        attn = jnp.dot(ctx_cat.astype(mmt), wo_ref[l],
                       preferred_element_type=jnp.float32) + vec_ref[l, 0:1]
        # dropout1 = identity (eval mode)
        x = _layer_norm(x + attn, vec_ref[l, 1:2], vec_ref[l, 2:3])

        # ---- feed-forward: full-width zero-padded matmuls (no :F slices) ----
        h1 = jnp.maximum(
            jnp.dot(x.astype(mmt), ffw_ref[l, 0],
                    preferred_element_type=jnp.float32) + vec_ref[l, 3:4], 0.0)
        ff = jnp.dot(h1.astype(mmt), ffw_ref[l, 1],
                     preferred_element_type=jnp.float32) + vec_ref[l, 4:5]
        # dropout2 = identity (eval mode)
        x = _layer_norm(x + ff, vec_ref[l, 5:6], vec_ref[l, 6:7])

    # ---- head: AdaptiveAvgPool1d(1) over S + Linear -> ReLU -> Linear(->1) ----
    pooled = jnp.mean(x.reshape(Bt, S, E), axis=1)                        # (Bt, E)
    hmid = jnp.maximum(
        jnp.dot(pooled.astype(mmt), hw1_ref[...],
                preferred_element_type=jnp.float32) + hvec_ref[0:1], 0.0) # (Bt, U)
    # Final Linear(U->1) as elementwise*reduce; store all Bt scalars lane-dense.
    out_row = jnp.sum(hmid * hvec_ref[1:2], axis=-1).reshape(1, Bt) \
        + hvec_ref[2:3, 0:1]                                              # (1, Bt)
    o_ref[0] = out_row.astype(o_ref.dtype)


def time_series_transformer(x, params, *, num_heads, num_layers, batch_tile=None):
    B, S, E = x.shape
    # Fold the whole (small) batch into one grid step by default; pick
    # batch_tile = ceil(B/2) on v7x if you want both TensorCores busy.
    Bt = B if batch_tile is None else batch_tile
    assert B % Bt == 0, "batch must be divisible by batch_tile"
    nt = B // Bt

    qkvw, qkvb, wo = params["qkvw"], params["qkvb"], params["wo"]
    ffw, vec = params["ffw"], params["vec"]
    hw1, hv = params["head_w1t"], params["head_vec"]

    out = pl.pallas_call(
        partial(fused_tst_kernel, num_layers=num_layers, num_heads=num_heads),
        out_shape=jax.ShapeDtypeStruct((nt, 1, Bt), x.dtype),
        grid=(nt,),
        in_specs=[
            pl.BlockSpec((Bt, S, E), lambda b: (b, 0, 0)),        # activations
            pl.BlockSpec(qkvw.shape, lambda b: (0, 0, 0)),        # (L, E, 3E)   bf16
            pl.BlockSpec(qkvb.shape, lambda b: (0, 0, 0)),        # (L, 1, 3E)   f32
            pl.BlockSpec(wo.shape,   lambda b: (0, 0, 0)),        # (L, E, E)    bf16
            pl.BlockSpec(ffw.shape,  lambda b: (0, 0, 0, 0)),     # (L, 2, E, E) bf16
            pl.BlockSpec(vec.shape,  lambda b: (0, 0, 0)),        # (L, 7, E)    f32
            pl.BlockSpec(hw1.shape,  lambda b: (0, 0)),           # (E, U)       bf16
            pl.BlockSpec(hv.shape,   lambda b: (0, 0)),           # (3, U)       f32
        ],
        out_specs=pl.BlockSpec((1, 1, Bt), lambda b: (b, 0, 0)),  # lane-dense store
        compiler_params=pltpu.CompilerParams(
            dimension_semantics=("parallel",),   # batch-tile axis feeds both TCs on v7x
            vmem_limit_bytes=32 * 1024 * 1024),  # explicit; whole model is << 1 MiB
    )(x, qkvw, qkvb, wo, ffw, vec, hw1, hv)
    return out.reshape(B, 1)


# ----------------------------------------------------------------------------
# Parameter construction (PyTorch-shaped) and host-side packing.
# ----------------------------------------------------------------------------
def init_raw_params(key, num_blocks, E, F, mlp_units):
    blocks = []
    for _ in range(num_blocks):
        key, k0, k1, k2, k3, k4 = jax.random.split(key, 6)
        blocks.append(dict(
            wqkv=jax.random.normal(k0, (3 * E, E), jnp.float32) * 0.1,  # in_proj_weight
            bqkv=jax.random.normal(k1, (3 * E,), jnp.float32) * 0.01,   # in_proj_bias
            wo=jax.random.normal(k2, (E, E), jnp.float32) * 0.1,        # out_proj.weight
            bo=jnp.zeros((E,), jnp.float32),
            g1=jnp.ones((E,), jnp.float32), bt1=jnp.zeros((E,), jnp.float32),
            wff1=jax.random.normal(k3, (F, E), jnp.float32) * 0.1,      # conv1.weight (F,E,1)
            bff1=jnp.zeros((F,), jnp.float32),
            wff2=jax.random.normal(k4, (E, F), jnp.float32) * 0.1,      # conv2.weight (E,F,1)
            bff2=jnp.zeros((E,), jnp.float32),
            g2=jnp.ones((E,), jnp.float32), bt2=jnp.zeros((E,), jnp.float32),
        ))
    U = mlp_units[0]
    key, k1, k2, k3, k4 = jax.random.split(key, 5)
    mlp = dict(
        w1=jax.random.normal(k1, (U, E), jnp.float32) * 0.1,
        b1=jax.random.normal(k2, (U,), jnp.float32) * 0.01,
        w2=jax.random.normal(k3, (1, U), jnp.float32) * 0.1,
        b2=jax.random.normal(k4, (1,), jnp.float32) * 0.01,
    )
    return blocks, mlp


def pack_params(blocks, mlp, E, H, F, matmul_dtype=jnp.bfloat16):
    """Host-side packing: fuse QKV across heads into one (E,3E) slab with the
    1/sqrt(dh) scale folded into Q, pre-transpose Wo, zero-pad the FF weights to
    (E,E), and stack everything into a few (L, ...) slabs."""
    assert F <= E, "full-width padded FF packing assumes ff_dim <= embed_dim"
    # TODO(synk): for ff_dim > embed_dim, pack the two FF slabs separately (E,F)/(F,E).
    dh = E // H
    scale = 1.0 / math.sqrt(dh)
    qkvw_l, qkvb_l, wo_l, ffw_l, vec_l = [], [], [], [], []
    for p in blocks:
        wq, wk, wv = p["wqkv"][:E], p["wqkv"][E:2 * E], p["wqkv"][2 * E:]
        bq, bk, bv = p["bqkv"][:E], p["bqkv"][E:2 * E], p["bqkv"][2 * E:]
        # qkv = x @ [Wq^T*scale | Wk^T | Wv^T]    -> single lane-dense matmul
        qkvw_l.append(jnp.concatenate([wq.T * scale, wk.T, wv.T], axis=1))  # (E, 3E)
        qkvb_l.append(jnp.concatenate([bq * scale, bk, bv])[None, :])       # (1, 3E)
        wo_l.append(p["wo"].T)                                              # (E, E) = Wo^T
        ffw = jnp.zeros((2, E, E), jnp.float32)
        ffw = ffw.at[0, :, :F].set(p["wff1"].T)                             # (E, F) padded
        ffw = ffw.at[1, :F, :].set(p["wff2"].T)                             # (F, E) padded
        ffw_l.append(ffw)
        vec = jnp.zeros((7, E), jnp.float32)
        vec = vec.at[0].set(p["bo"])
        vec = vec.at[1].set(p["g1"]); vec = vec.at[2].set(p["bt1"])
        vec = vec.at[3, :F].set(p["bff1"])
        vec = vec.at[4].set(p["bff2"])
        vec = vec.at[5].set(p["g2"]); vec = vec.at[6].set(p["bt2"])
        vec_l.append(vec)

    U = mlp["w1"].shape[0]
    head_vec = jnp.zeros((3, U), jnp.float32)
    head_vec = head_vec.at[0].set(mlp["b1"])
    head_vec = head_vec.at[1].set(mlp["w2"][0])
    head_vec = head_vec.at[2, 0].set(mlp["b2"][0])

    return dict(
        qkvw=jnp.stack(qkvw_l).astype(matmul_dtype),     # (L, E, 3E)
        qkvb=jnp.stack(qkvb_l),                          # (L, 1, 3E) f32 (scale folded)
        wo=jnp.stack(wo_l).astype(matmul_dtype),         # (L, E, E)
        ffw=jnp.stack(ffw_l).astype(matmul_dtype),       # (L, 2, E, E)  (zero-padded)
        vec=jnp.stack(vec_l),                            # (L, 7, E) f32
        head_w1t=mlp["w1"].T.astype(matmul_dtype),       # (E, U)
        head_vec=head_vec,                               # (3, U) f32
    )


# ----------------------------------------------------------------------------
# Pure-JAX f32 mirror of the PyTorch module (eval mode) for a sanity check.
# ----------------------------------------------------------------------------
def reference_forward(x, blocks, mlp, num_heads):
    B, S, E = x.shape
    H = num_heads
    dh = E // H

    def ln(t, g, b, eps=1e-5):
        mu = t.mean(-1, keepdims=True)
        var = ((t - mu) ** 2).mean(-1, keepdims=True)
        return (t - mu) / jnp.sqrt(var + eps) * g + b

    for p in blocks:
        q = x @ p["wqkv"][:E].T + p["bqkv"][:E]
        k = x @ p["wqkv"][E:2 * E].T + p["bqkv"][E:2 * E]
        v = x @ p["wqkv"][2 * E:].T + p["bqkv"][2 * E:]
        sh = lambda t: t.reshape(B, S, H, dh).transpose(0, 2, 1, 3)
        qh, kh, vh = sh(q), sh(k), sh(v)
        s = jnp.einsum("bhqd,bhkd->bhqk", qh, kh) / math.sqrt(dh)
        pr = jax.nn.softmax(s, axis=-1)
        ctx = jnp.einsum("bhqk,bhkd->bhqd", pr, vh)
        ctx = ctx.transpose(0, 2, 1, 3).reshape(B, S, E)
        attn = ctx @ p["wo"].T + p["bo"]
        x = ln(x + attn, p["g1"], p["bt1"])
        h1 = jax.nn.relu(x @ p["wff1"].T + p["bff1"])
        ff = h1 @ p["wff2"].T + p["bff2"]
        x = ln(x + ff, p["g2"], p["bt2"])
    pooled = x.mean(axis=1)
    hmid = jax.nn.relu(pooled @ mlp["w1"].T + mlp["b1"])
    return hmid @ mlp["w2"].T + mlp["b2"]


if __name__ == "__main__":
    # small but TPU-friendly config (embed_dim divisible by num_heads)
    B, S, E, H, F = 2, 8, 32, 4, 16
    NUM_BLOCKS = 2
    MLP_UNITS = [64]

    key = jax.random.PRNGKey(0)
    kx, kp = jax.random.split(key)
    x = jax.random.normal(kx, (B, S, E), jnp.float32)
    blocks, mlp = init_raw_params(kp, NUM_BLOCKS, E, F, MLP_UNITS)
    params = pack_params(blocks, mlp, E, H, F)

    out = time_series_transformer(x, params, num_heads=H, num_layers=NUM_BLOCKS)
    out = jax.block_until_ready(out)
    assert out.shape == (B, 1) and out.dtype == jnp.float32

    # bf16 MXU inputs (f32 accumulate) + approx-reciprocal softmax -> loose tolerance.
    ref = reference_forward(x, blocks, mlp, H)
    assert jnp.allclose(out, ref, atol=1e-1, rtol=1e-1), (out, ref)
    print("KERNEL_OK")
</pallas_src>

<mosaic_0001>
module attributes {stable_mosaic.version = 11 : i64} {
  func.func @fused_tst_kernel(%arg0: i32, %arg1: memref<2x8x32xf32, #tpu.memory_space<vmem>>, %arg2: memref<2x32x96xbf16, #tpu.memory_space<vmem>>, %arg3: memref<2x1x96xf32, #tpu.memory_space<vmem>>, %arg4: memref<2x32x32xbf16, #tpu.memory_space<vmem>>, %arg5: memref<2x2x32x32xbf16, #tpu.memory_space<vmem>>, %arg6: memref<2x7x32xf32, #tpu.memory_space<vmem>>, %arg7: memref<32x64xbf16, #tpu.memory_space<vmem>>, %arg8: memref<3x64xf32, #tpu.memory_space<vmem>>, %arg9: memref<1x1x2xf32, #tpu.memory_space<vmem>>) attributes {dimension_semantics = [#tpu.dimension_semantics<parallel>], iteration_bounds = array<i64: 1>, scalar_prefetch = 0 : i64, scratch_operands = 0 : i64, tpu.core_type = #tpu.core_type<tc>, window_params = [{transform_indices = @transform_0, window_bounds = array<i64: 2, 8, 32>}, {pipeline_mode = #tpu.pipeline_mode<synchronous>, transform_indices = @transform_1, window_bounds = array<i64: 2, 32, 96>}, {pipeline_mode = #tpu.pipeline_mode<synchronous>, transform_indices = @transform_2, window_bounds = array<i64: 2, 1, 96>}, {pipeline_mode = #tpu.pipeline_mode<synchronous>, transform_indices = @transform_3, window_bounds = array<i64: 2, 32, 32>}, {pipeline_mode = #tpu.pipeline_mode<synchronous>, transform_indices = @transform_4, window_bounds = array<i64: 2, 2, 32, 32>}, {pipeline_mode = #tpu.pipeline_mode<synchronous>, transform_indices = @transform_5, window_bounds = array<i64: 2, 7, 32>}, {pipeline_mode = #tpu.pipeline_mode<synchronous>, transform_indices = @transform_6, window_bounds = array<i64: 32, 64>}, {pipeline_mode = #tpu.pipeline_mode<synchronous>, transform_indices = @transform_7, window_bounds = array<i64: 3, 64>}, {transform_indices = @transform_8, window_bounds = array<i64: 1, 1, 2>}]} {
    %c0 = arith.constant 0 : index
    %c0_0 = arith.constant 0 : index
    %c0_1 = arith.constant 0 : index
    %0 = vector.load %arg1[%c0, %c0_0, %c0_1] : memref<2x8x32xf32, #tpu.memory_space<vmem>>, vector<2x8x32xf32>
    %1 = vector.shape_cast %0 : vector<2x8x32xf32> to vector<16x32xf32>
    %2 = arith.truncf %1 : vector<16x32xf32> to vector<16x32xbf16>
    %c0_2 = arith.constant 0 : index
    %c0_3 = arith.constant 0 : index
    %c0_4 = arith.constant 0 : index
    %3 = vector.load %arg2[%c0_2, %c0_3, %c0_4] : memref<2x32x96xbf16, #tpu.memory_space<vmem>>, vector<1x32x96xbf16>
    %4 = vector.shape_cast %3 : vector<1x32x96xbf16> to vector<32x96xbf16>
    %cst = arith.constant dense<0.000000e+00> : vector<16x96xf32>
    %5 = tpu.matmul %2, %4, %cst {dimension_numbers = #tpu.dot_dimension_numbers<[1], [0], [0], [1], [0, 0, 1, 1], [], []>} : vector<16x32xbf16>, vector<32x96xbf16>, vector<16x96xf32> -> vector<16x96xf32>
    %c0_5 = arith.constant 0 : index
    %c0_6 = arith.constant 0 : index
    %c0_7 = arith.constant 0 : index
    %6 = vector.load %arg3[%c0_5, %c0_6, %c0_7] : memref<2x1x96xf32, #tpu.memory_space<vmem>>, vector<1x1x96xf32>
    %7 = vector.shape_cast %6 : vector<1x1x96xf32> to vector<1x96xf32>
    %8 = vector.broadcast %7 : vector<1x96xf32> to vector<16x96xf32>
    %9 = arith.addf %5, %8 : vector<16x96xf32>
    %10 = arith.truncf %9 : vector<16x96xf32> to vector<16x96xbf16>
    %11 = vector.extract_strided_slice %10 {offsets = [0, 0], sizes = [16, 8], strides = [1, 1]} : vector<16x96xbf16> to vector<16x8xbf16>
    %12 = vector.shape_cast %11 : vector<16x8xbf16> to vector<2x8x8xbf16>
    %13 = vector.extract_strided_slice %10 {offsets = [0, 32], sizes = [16, 8], strides = [1, 1]} : vector<16x96xbf16> to vector<16x8xbf16>
    %14 = vector.shape_cast %13 : vector<16x8xbf16> to vector<2x8x8xbf16>
    %15 = vector.extract_strided_slice %10 {offsets = [0, 64], sizes = [16, 8], strides = [1, 1]} : vector<16x96xbf16> to vector<16x8xbf16>
    %16 = vector.shape_cast %15 : vector<16x8xbf16> to vector<2x8x8xbf16>
    "tpu.trace_start"() <{level = 10 : i32, message = "bqd,bkd->bqk"}> : () -> ()
    %cst_8 = arith.constant dense<0.000000e+00> : vector<2x8x8xf32>
    %17 = tpu.matmul %12, %14, %cst_8 {dimension_numbers = #tpu.dot_dimension_numbers<[2], [2], [1], [1], [0, 0, 0, 1, 1, 1], [0], [0]>} : vector<2x8x8xbf16>, vector<2x8x8xbf16>, vector<2x8x8xf32> -> vector<2x8x8xf32>
    "tpu.trace_stop"() : () -> ()
    %cst_9 = arith.constant dense<0xFF800000> : vector<2x8xf32>
    %18 = vector.multi_reduction <maximumf>, %17, %cst_9 [2] : vector<2x8x8xf32> to vector<2x8xf32>
    %19 = vector.shape_cast %18 : vector<2x8xf32> to vector<2x8x1xf32>
    %20 = vector.broadcast %19 : vector<2x8x1xf32> to vector<2x8x8xf32>
    %21 = arith.subf %17, %20 : vector<2x8x8xf32>
    %22 = math.exp %21 : vector<2x8x8xf32>
    %cst_10 = arith.constant dense<0.000000e+00> : vector<2x8xf32>
    %23 = vector.multi_reduction <add>, %22, %cst_10 [2] : vector<2x8x8xf32> to vector<2x8xf32>
    %24 = vector.shape_cast %23 : vector<2x8xf32> to vector<2x8x1xf32>
    %25 = tpu.reciprocal %24 {approx = true} : vector<2x8x1xf32> -> vector<2x8x1xf32>
    %26 = vector.broadcast %25 : vector<2x8x1xf32> to vector<2x8x8xf32>
    %27 = arith.mulf %22, %26 : vector<2x8x8xf32>
    %28 = arith.truncf %27 : vector<2x8x8xf32> to vector<2x8x8xbf16>
    "tpu.trace_start"() <{level = 10 : i32, message = "bqk,bkd->bqd"}> : () -> ()
    %cst_11 = arith.constant dense<0.000000e+00> : vector<2x8x8xf32>
    %29 = tpu.matmul %28, %16, %cst_11 {dimension_numbers = #tpu.dot_dimension_numbers<[2], [1], [1], [2], [0, 0, 0, 1, 1, 2], [0], [0]>} : vector<2x8x8xbf16>, vector<2x8x8xbf16>, vector<2x8x8xf32> -> vector<2x8x8xf32>
    "tpu.trace_stop"() : () -> ()
    %30 = vector.shape_cast %29 : vector<2x8x8xf32> to vector<16x8xf32>
    %31 = vector.extract_strided_slice %10 {offsets = [0, 8], sizes = [16, 8], strides = [1, 1]} : vector<16x96xbf16> to vector<16x8xbf16>
    %32 = vector.shape_cast %31 : vector<16x8xbf16> to vector<2x8x8xbf16>
    %33 = vector.extract_strided_slice %10 {offsets = [0, 40], sizes = [16, 8], strides = [1, 1]} : vector<16x96xbf16> to vector<16x8xbf16>
    %34 = vector.shape_cast %33 : vector<16x8xbf16> to vector<2x8x8xbf16>
    %35 = vector.extract_strided_slice %10 {offsets = [0, 72], sizes = [16, 8], strides = [1, 1]} : vector<16x96xbf16> to vector<16x8xbf16>
    %36 = vector.shape_cast %35 : vector<16x8xbf16> to vector<2x8x8xbf16>
    "tpu.trace_start"() <{level = 10 : i32, message = "bqd,bkd->bqk"}> : () -> ()
    %cst_12 = arith.constant dense<0.000000e+00> : vector<2x8x8xf32>
    %37 = tpu.matmul %32, %34, %cst_12 {dimension_numbers = #tpu.dot_dimension_numbers<[2], [2], [1], [1], [0, 0, 0, 1, 1, 1], [0], [0]>} : vector<2x8x8xbf16>, vector<2x8x8xbf16>, vector<2x8x8xf32> -> vector<2x8x8xf32>
    "tpu.trace_stop"() : () -> ()
    %cst_13 = arith.constant dense<0xFF800000> : vector<2x8xf32>
    %38 = vector.multi_reduction <maximumf>, %37, %cst_13 [2] : vector<2x8x8xf32> to vector<2x8xf32>
    %39 = vector.shape_cast %38 : vector<2x8xf32> to vector<2x8x1xf32>
    %40 = vector.broadcast %39 : vector<2x8x1xf32> to vector<2x8x8xf32>
    %41 = arith.subf %37, %40 : vector<2x8x8xf32>
    %42 = math.exp %41 : vector<2x8x8xf32>
    %cst_14 = arith.constant dense<0.000000e+00> : vector<2x8xf32>
    %43 = vector.multi_reduction <add>, %42, %cst_14 [2] : vector<2x8x8xf32> to vector<2x8xf32>
    %44 = vector.shape_cast %43 : vector<2x8xf32> to vector<2x8x1xf32>
    %45 = tpu.reciprocal %44 {approx = true} : vector<2x8x1xf32> -> vector<2x8x1xf32>
    %46 = vector.broadcast %45 : vector<2x8x1xf32> to vector<2x8x8xf32>
    %47 = arith.mulf %42, %46 : vector<2x8x8xf32>
    %48 = arith.truncf %47 : vector<2x8x8xf32> to vector<2x8x8xbf16>
    "tpu.trace_start"() <{level = 10 : i32, message = "bqk,bkd->bqd"}> : () -> ()
    %cst_15 = arith.constant dense<0.000000e+00> : vector<2x8x8xf32>
    %49 = tpu.matmul %48, %36, %cst_15 {dimension_numbers = #tpu.dot_dimension_numbers<[2], [1], [1], [2], [0, 0, 0, 1, 1, 2], [0], [0]>} : vector<2x8x8xbf16>, vector<2x8x8xbf16>, vector<2x8x8xf32> -> vector<2x8x8xf32>
    "tpu.trace_stop"() : () -> ()
    %50 = vector.shape_cast %49 : vector<2x8x8xf32> to vector<16x8xf32>
    %51 = vector.extract_strided_slice %10 {offsets = [0, 16], sizes = [16, 8], strides = [1, 1]} : vector<16x96xbf16> to vector<16x8xbf16>
    %52 = vector.shape_cast %51 : vector<16x8xbf16> to vector<2x8x8xbf16>
    %53 = vector.extract_strided_slice %10 {offsets = [0, 48], sizes = [16, 8], strides = [1, 1]} : vector<16x96xbf16> to vector<16x8xbf16>
    %54 = vector.shape_cast %53 : vector<16x8xbf16> to vector<2x8x8xbf16>
    %55 = vector.extract_strided_slice %10 {offsets = [0, 80], sizes = [16, 8], strides = [1, 1]} : vector<16x96xbf16> to vector<16x8xbf16>
    %56 = vector.shape_cast %55 : vector<16x8xbf16> to vector<2x8x8xbf16>
    "tpu.trace_start"() <{level = 10 : i32, message = "bqd,bkd->bqk"}> : () -> ()
    %cst_16 = arith.constant dense<0.000000e+00> : vector<2x8x8xf32>
    %57 = tpu.matmul %52, %54, %cst_16 {dimension_numbers = #tpu.dot_dimension_numbers<[2], [2], [1], [1], [0, 0, 0, 1, 1, 1], [0], [0]>} : vector<2x8x8xbf16>, vector<2x8x8xbf16>, vector<2x8x8xf32> -> vector<2x8x8xf32>
    "tpu.trace_stop"() : () -> ()
    %cst_17 = arith.constant dense<0xFF800000> : vector<2x8xf32>
    %58 = vector.multi_reduction <maximumf>, %57, %cst_17 [2] : vector<2x8x8xf32> to vector<2x8xf32>
    %59 = vector.shape_cast %58 : vector<2x8xf32> to vector<2x8x1xf32>
    %60 = vector.broadcast %59 : vector<2x8x1xf32> to vector<2x8x8xf32>
    %61 = arith.subf %57, %60 : vector<2x8x8xf32>
    %62 = math.exp %61 : vector<2x8x8xf32>
    %cst_18 = arith.constant dense<0.000000e+00> : vector<2x8xf32>
    %63 = vector.multi_reduction <add>, %62, %cst_18 [2] : vector<2x8x8xf32> to vector<2x8xf32>
    %64 = vector.shape_cast %63 : vector<2x8xf32> to vector<2x8x1xf32>
    %65 = tpu.reciprocal %64 {approx = true} : vector<2x8x1xf32> -> vector<2x8x1xf32>
    %66 = vector.broadcast %65 : vector<2x8x1xf32> to vector<2x8x8xf32>
    %67 = arith.mulf %62, %66 : vector<2x8x8xf32>
    %68 = arith.truncf %67 : vector<2x8x8xf32> to vector<2x8x8xbf16>
    "tpu.trace_start"() <{level = 10 : i32, message = "bqk,bkd->bqd"}> : () -> ()
    %cst_19 = arith.constant dense<0.000000e+00> : vector<2x8x8xf32>
    %69 = tpu.matmul %68, %56, %cst_19 {dimension_numbers = #tpu.dot_dimension_numbers<[2], [1], [1], [2], [0, 0, 0, 1, 1, 2], [0], [0]>} : vector<2x8x8xbf16>, vector<2x8x8xbf16>, vector<2x8x8xf32> -> vector<2x8x8xf32>
    "tpu.trace_stop"() : () -> ()
    %70 = vector.shape_cast %69 : vector<2x8x8xf32> to vector<16x8xf32>
    %71 = vector.extract_strided_slice %10 {offsets = [0, 24], sizes = [16, 8], strides = [1, 1]} : vector<16x96xbf16> to vector<16x8xbf16>
    %72 = vector.shape_cast %71 : vector<16x8xbf16> to vector<2x8x8xbf16>
    %73 = vector.extract_strided_slice %10 {offsets = [0, 56], sizes = [16, 8], strides = [1, 1]} : vector<16x96xbf16> to vector<16x8xbf16>
    %74 = vector.shape_cast %73 : vector<16x8xbf16> to vector<2x8x8xbf16>
    %75 = vector.extract_strided_slice %10 {offsets = [0, 88], sizes = [16, 8], strides = [1, 1]} : vector<16x96xbf16> to vector<16x8xbf16>
    %76 = vector.shape_cast %75 : vector<16x8xbf16> to vector<2x8x8xbf16>
    "tpu.trace_start"() <{level = 10 : i32, message = "bqd,bkd->bqk"}> : () -> ()
    %cst_20 = arith.constant dense<0.000000e+00> : vector<2x8x8xf32>
    %77 = tpu.matmul %72, %74, %cst_20 {dimension_numbers = #tpu.dot_dimension_numbers<[2], [2], [1], [1], [0, 0, 0, 1, 1, 1], [0], [0]>} : vector<2x8x8xbf16>, vector<2x8x8xbf16>, vector<2x8x8xf32> -> vector<2x8x8xf32>
    "tpu.trace_stop"() : () -> ()
    %cst_21 = arith.constant dense<0xFF800000> : vector<2x8xf32>
    %78 = vector.multi_reduction <maximumf>, %77, %cst_21 [2] : vector<2x8x8xf32> to vector<2x8xf32>
    %79 = vector.shape_cast %78 : vector<2x8xf32> to vector<2x8x1xf32>
    %80 = vector.broadcast %79 : vector<2x8x1xf32> to vector<2x8x8xf32>
    %81 = arith.subf %77, %80 : vector<2x8x8xf32>
    %82 = math.exp %81 : vector<2x8x8xf32>
    %cst_22 = arith.constant dense<0.000000e+00> : vector<2x8xf32>
    %83 = vector.multi_reduction <add>, %82, %cst_22 [2] : vector<2x8x8xf32> to vector<2x8xf32>
    %84 = vector.shape_cast %83 : vector<2x8xf32> to vector<2x8x1xf32>
    %85 = tpu.reciprocal %84 {approx = true} : vector<2x8x1xf32> -> vector<2x8x1xf32>
    %86 = vector.broadcast %85 : vector<2x8x1xf32> to vector<2x8x8xf32>
    %87 = arith.mulf %82, %86 : vector<2x8x8xf32>
    %88 = arith.truncf %87 : vector<2x8x8xf32> to vector<2x8x8xbf16>
    "tpu.trace_start"() <{level = 10 : i32, message = "bqk,bkd->bqd"}> : () -> ()
    %cst_23 = arith.constant dense<0.000000e+00> : vector<2x8x8xf32>
    %89 = tpu.matmul %88, %76, %cst_23 {dimension_numbers = #tpu.dot_dimension_numbers<[2], [1], [1], [2], [0, 0, 0, 1, 1, 2], [0], [0]>} : vector<2x8x8xbf16>, vector<2x8x8xbf16>, vector<2x8x8xf32> -> vector<2x8x8xf32>
    "tpu.trace_stop"() : () -> ()
    %90 = vector.shape_cast %89 : vector<2x8x8xf32> to vector<16x8xf32>
    %91 = tpu.concatenate %30, %50, %70, %90 in 1 : vector<16x8xf32>, vector<16x8xf32>, vector<16x8xf32>, vector<16x8xf32> -> vector<16x32xf32>
    %92 = arith.truncf %91 : vector<16x32xf32> to vector<16x32xbf16>
    %c0_24 = arith.constant 0 : index
    %c0_25 = arith.constant 0 : index
    %c0_26 = arith.constant 0 : index
    %93 = vector.load %arg4[%c0_24, %c0_25, %c0_26] : memref<2x32x32xbf16, #tpu.memory_space<vmem>>, vector<1x32x32xbf16>
    %94 = vector.shape_cast %93 : vector<1x32x32xbf16> to vector<32x32xbf16>
    %cst_27 = arith.constant dense<0.000000e+00> : vector<16x32xf32>
    %95 = tpu.matmul %92, %94, %cst_27 {dimension_numbers = #tpu.dot_dimension_numbers<[1], [0], [0], [1], [0, 0, 1, 1], [], []>} : vector<16x32xbf16>, vector<32x32xbf16>, vector<16x32xf32> -> vector<16x32xf32>
    %c0_28 = arith.constant 0 : index
    %c0_29 = arith.constant 0 : index
    %c0_30 = arith.constant 0 : index
    %96 = vector.load %arg6[%c0_28, %c0_29, %c0_30] : memref<2x7x32xf32, #tpu.memory_space<vmem>>, vector<1x1x32xf32>
    %97 = vector.shape_cast %96 : vector<1x1x32xf32> to vector<1x32xf32>
    %98 = vector.broadcast %97 : vector<1x32xf32> to vector<16x32xf32>
    %99 = arith.addf %95, %98 : vector<16x32xf32>
    %100 = arith.addf %1, %99 : vector<16x32xf32>
    %c0_31 = arith.constant 0 : index
    %c1 = arith.constant 1 : index
    %c0_32 = arith.constant 0 : index
    %101 = vector.load %arg6[%c0_31, %c1, %c0_32] : memref<2x7x32xf32, #tpu.memory_space<vmem>>, vector<1x1x32xf32>
    %102 = vector.shape_cast %101 : vector<1x1x32xf32> to vector<1x32xf32>
    %c0_33 = arith.constant 0 : index
    %c2 = arith.constant 2 : index
    %c0_34 = arith.constant 0 : index
    %103 = vector.load %arg6[%c0_33, %c2, %c0_34] : memref<2x7x32xf32, #tpu.memory_space<vmem>>, vector<1x1x32xf32>
    %104 = vector.shape_cast %103 : vector<1x1x32xf32> to vector<1x32xf32>
    %cst_35 = arith.constant dense<0.000000e+00> : vector<16xf32>
    %105 = vector.multi_reduction <add>, %100, %cst_35 [1] : vector<16x32xf32> to vector<16xf32>
    %106 = vector.shape_cast %105 : vector<16xf32> to vector<16x1xf32>
    %cst_36 = arith.constant 3.200000e+01 : f32
    %107 = vector.broadcast %cst_36 : f32 to vector<16x1xf32>
    %108 = arith.divf %106, %107 : vector<16x1xf32>
    %109 = vector.broadcast %108 : vector<16x1xf32> to vector<16x32xf32>
    %110 = arith.subf %100, %109 : vector<16x32xf32>
    %111 = arith.mulf %110, %110 : vector<16x32xf32>
    %cst_37 = arith.constant dense<0.000000e+00> : vector<16xf32>
    %112 = vector.multi_reduction <add>, %111, %cst_37 [1] : vector<16x32xf32> to vector<16xf32>
    %113 = vector.shape_cast %112 : vector<16xf32> to vector<16x1xf32>
    %cst_38 = arith.constant 3.200000e+01 : f32
    %114 = vector.broadcast %cst_38 : f32 to vector<16x1xf32>
    %115 = arith.divf %113, %114 : vector<16x1xf32>
    %116 = vector.broadcast %108 : vector<16x1xf32> to vector<16x32xf32>
    %117 = arith.subf %100, %116 : vector<16x32xf32>
    %cst_39 = arith.constant 9.99999974E-6 : f32
    %118 = vector.broadcast %cst_39 : f32 to vector<16x1xf32>
    %119 = arith.addf %115, %118 : vector<16x1xf32>
    %120 = math.rsqrt %119 : vector<16x1xf32>
    %121 = vector.broadcast %120 : vector<16x1xf32> to vector<16x32xf32>
    %122 = arith.mulf %117, %121 : vector<16x32xf32>
    %123 = vector.broadcast %102 : vector<1x32xf32> to vector<16x32xf32>
    %124 = arith.mulf %122, %123 : vector<16x32xf32>
    %125 = vector.broadcast %104 : vector<1x32xf32> to vector<16x32xf32>
    %126 = arith.addf %124, %125 : vector<16x32xf32>
    %127 = arith.truncf %126 : vector<16x32xf32> to vector<16x32xbf16>
    %c0_40 = arith.constant 0 : index
    %c0_41 = arith.constant 0 : index
    %c0_42 = arith.constant 0 : index
    %c0_43 = arith.constant 0 : index
    %128 = vector.load %arg5[%c0_40, %c0_41, %c0_42, %c0_43] : memref<2x2x32x32xbf16, #tpu.memory_space<vmem>>, vector<1x1x32x32xbf16>
    %129 = vector.shape_cast %128 : vector<1x1x32x32xbf16> to vector<32x32xbf16>
    %cst_44 = arith.constant dense<0.000000e+00> : vector<16x32xf32>
    %130 = tpu.matmul %127, %129, %cst_44 {dimension_numbers = #tpu.dot_dimension_numbers<[1], [0], [0], [1], [0, 0, 1, 1], [], []>} : vector<16x32xbf16>, vector<32x32xbf16>, vector<16x32xf32> -> vector<16x32xf32>
    %c0_45 = arith.constant 0 : index
    %c3 = arith.constant 3 : index
    %c0_46 = arith.constant 0 : index
    %131 = vector.load %arg6[%c0_45, %c3, %c0_46] : memref<2x7x32xf32, #tpu.memory_space<vmem>>, vector<1x1x32xf32>
    %132 = vector.shape_cast %131 : vector<1x1x32xf32> to vector<1x32xf32>
    %133 = vector.broadcast %132 : vector<1x32xf32> to vector<16x32xf32>
    %134 = arith.addf %130, %133 : vector<16x32xf32>
    %cst_47 = arith.constant 0.000000e+00 : f32
    %135 = vector.broadcast %cst_47 : f32 to vector<16x32xf32>
    %136 = arith.maximumf %134, %135 : vector<16x32xf32>
    %137 = arith.truncf %136 : vector<16x32xf32> to vector<16x32xbf16>
    %c0_48 = arith.constant 0 : index
    %c1_49 = arith.constant 1 : index
    %c0_50 = arith.constant 0 : index
    %c0_51 = arith.constant 0 : index
    %138 = vector.load %arg5[%c0_48, %c1_49, %c0_50, %c0_51] : memref<2x2x32x32xbf16, #tpu.memory_space<vmem>>, vector<1x1x32x32xbf16>
    %139 = vector.shape_cast %138 : vector<1x1x32x32xbf16> to vector<32x32xbf16>
    %cst_52 = arith.constant dense<0.000000e+00> : vector<16x32xf32>
    %140 = tpu.matmul %137, %139, %cst_52 {dimension_numbers = #tpu.dot_dimension_numbers<[1], [0], [0], [1], [0, 0, 1, 1], [], []>} : vector<16x32xbf16>, vector<32x32xbf16>, vector<16x32xf32> -> vector<16x32xf32>
    %c0_53 = arith.constant 0 : index
    %c4 = arith.constant 4 : index
    %c0_54 = arith.constant 0 : index
    %141 = vector.load %arg6[%c0_53, %c4, %c0_54] : memref<2x7x32xf32, #tpu.memory_space<vmem>>, vector<1x1x32xf32>
    %142 = vector.shape_cast %141 : vector<1x1x32xf32> to vector<1x32xf32>
    %143 = vector.broadcast %142 : vector<1x32xf32> to vector<16x32xf32>
    %144 = arith.addf %140, %143 : vector<16x32xf32>
    %145 = arith.addf %126, %144 : vector<16x32xf32>
    %c0_55 = arith.constant 0 : index
    %c5 = arith.constant 5 : index
    %c0_56 = arith.constant 0 : index
    %146 = vector.load %arg6[%c0_55, %c5, %c0_56] : memref<2x7x32xf32, #tpu.memory_space<vmem>>, vector<1x1x32xf32>
    %147 = vector.shape_cast %146 : vector<1x1x32xf32> to vector<1x32xf32>
    %c0_57 = arith.constant 0 : index
    %c6 = arith.constant 6 : index
    %c0_58 = arith.constant 0 : index
    %148 = vector.load %arg6[%c0_57, %c6, %c0_58] : memref<2x7x32xf32, #tpu.memory_space<vmem>>, vector<1x1x32xf32>
    %149 = vector.shape_cast %148 : vector<1x1x32xf32> to vector<1x32xf32>
    %cst_59 = arith.constant dense<0.000000e+00> : vector<16xf32>
    %150 = vector.multi_reduction <add>, %145, %cst_59 [1] : vector<16x32xf32> to vector<16xf32>
    %151 = vector.shape_cast %150 : vector<16xf32> to vector<16x1xf32>
    %cst_60 = arith.constant 3.200000e+01 : f32
    %152 = vector.broadcast %cst_60 : f32 to vector<16x1xf32>
    %153 = arith.divf %151, %152 : vector<16x1xf32>
    %154 = vector.broadcast %153 : vector<16x1xf32> to vector<16x32xf32>
    %155 = arith.subf %145, %154 : vector<16x32xf32>
    %156 = arith.mulf %155, %155 : vector<16x32xf32>
    %cst_61 = arith.constant dense<0.000000e+00> : vector<16xf32>
    %157 = vector.multi_reduction <add>, %156, %cst_61 [1] : vector<16x32xf32> to vector<16xf32>
    %158 = vector.shape_cast %157 : vector<16xf32> to vector<16x1xf32>
    %cst_62 = arith.constant 3.200000e+01 : f32
    %159 = vector.broadcast %cst_62 : f32 to vector<16x1xf32>
    %160 = arith.divf %158, %159 : vector<16x1xf32>
    %161 = vector.broadcast %153 : vector<16x1xf32> to vector<16x32xf32>
    %162 = arith.subf %145, %161 : vector<16x32xf32>
    %cst_63 = arith.constant 9.99999974E-6 : f32
    %163 = vector.broadcast %cst_63 : f32 to vector<16x1xf32>
    %164 = arith.addf %160, %163 : vector<16x1xf32>
    %165 = math.rsqrt %164 : vector<16x1xf32>
    %166 = vector.broadcast %165 : vector<16x1xf32> to vector<16x32xf32>
    %167 = arith.mulf %162, %166 : vector<16x32xf32>
    %168 = vector.broadcast %147 : vector<1x32xf32> to vector<16x32xf32>
    %169 = arith.mulf %167, %168 : vector<16x32xf32>
    %170 = vector.broadcast %149 : vector<1x32xf32> to vector<16x32xf32>
    %171 = arith.addf %169, %170 : vector<16x32xf32>
    %172 = arith.truncf %171 : vector<16x32xf32> to vector<16x32xbf16>
    %c1_64 = arith.constant 1 : index
    %c0_65 = arith.constant 0 : index
    %c0_66 = arith.constant 0 : index
    %173 = vector.load %arg2[%c1_64, %c0_65, %c0_66] : memref<2x32x96xbf16, #tpu.memory_space<vmem>>, vector<1x32x96xbf16>
    %174 = vector.shape_cast %173 : vector<1x32x96xbf16> to vector<32x96xbf16>
    %cst_67 = arith.constant dense<0.000000e+00> : vector<16x96xf32>
    %175 = tpu.matmul %172, %174, %cst_67 {dimension_numbers = #tpu.dot_dimension_numbers<[1], [0], [0], [1], [0, 0, 1, 1], [], []>} : vector<16x32xbf16>, vector<32x96xbf16>, vector<16x96xf32> -> vector<16x96xf32>
    %c1_68 = arith.constant 1 : index
    %c0_69 = arith.constant 0 : index
    %c0_70 = arith.constant 0 : index
    %176 = vector.load %arg3[%c1_68, %c0_69, %c0_70] : memref<2x1x96xf32, #tpu.memory_space<vmem>>, vector<1x1x96xf32>
    %177 = vector.shape_cast %176 : vector<1x1x96xf32> to vector<1x96xf32>
    %178 = vector.broadcast %177 : vector<1x96xf32> to vector<16x96xf32>
    %179 = arith.addf %175, %178 : vector<16x96xf32>
    %180 = arith.truncf %179 : vector<16x96xf32> to vector<16x96xbf16>
    %181 = vector.extract_strided_slice %180 {offsets = [0, 0], sizes = [16, 8], strides = [1, 1]} : vector<16x96xbf16> to vector<16x8xbf16>
    %182 = vector.shape_cast %181 : vector<16x8xbf16> to vector<2x8x8xbf16>
    %183 = vector.extract_strided_slice %180 {offsets = [0, 32], sizes = [16, 8], strides = [1, 1]} : vector<16x96xbf16> to vector<16x8xbf16>
    %184 = vector.shape_cast %183 : vector<16x8xbf16> to vector<2x8x8xbf16>
    %185 = vector.extract_strided_slice %180 {offsets = [0, 64], sizes = [16, 8], strides = [1, 1]} : vector<16x96xbf16> to vector<16x8xbf16>
    %186 = vector.shape_cast %185 : vector<16x8xbf16> to vector<2x8x8xbf16>
    "tpu.trace_start"() <{level = 10 : i32, message = "bqd,bkd->bqk"}> : () -> ()
    %cst_71 = arith.constant dense<0.000000e+00> : vector<2x8x8xf32>
    %187 = tpu.matmul %182, %184, %cst_71 {dimension_numbers = #tpu.dot_dimension_numbers<[2], [2], [1], [1], [0, 0, 0, 1, 1, 1], [0], [0]>} : vector<2x8x8xbf16>, vector<2x8x8xbf16>, vector<2x8x8xf32> -> vector<2x8x8xf32>
    "tpu.trace_stop"() : () -> ()
    %cst_72 = arith.constant dense<0xFF800000> : vector<2x8xf32>
    %188 = vector.multi_reduction <maximumf>, %187, %cst_72 [2] : vector<2x8x8xf32> to vector<2x8xf32>
    %189 = vector.shape_cast %188 : vector<2x8xf32> to vector<2x8x1xf32>
    %190 = vector.broadcast %189 : vector<2x8x1xf32> to vector<2x8x8xf32>
    %191 = arith.subf %187, %190 : vector<2x8x8xf32>
    %192 = math.exp %191 : vector<2x8x8xf32>
    %cst_73 = arith.constant dense<0.000000e+00> : vector<2x8xf32>
    %193 = vector.multi_reduction <add>, %192, %cst_73 [2] : vector<2x8x8xf32> to vector<2x8xf32>
    %194 = vector.shape_cast %193 : vector<2x8xf32> to vector<2x8x1xf32>
    %195 = tpu.reciprocal %194 {approx = true} : vector<2x8x1xf32> -> vector<2x8x1xf32>
    %196 = vector.broadcast %195 : vector<2x8x1xf32> to vector<2x8x8xf32>
    %197 = arith.mulf %192, %196 : vector<2x8x8xf32>
    %198 = arith.truncf %197 : vector<2x8x8xf32> to vector<2x8x8xbf16>
    "tpu.trace_start"() <{level = 10 : i32, message = "bqk,bkd->bqd"}> : () -> ()
    %cst_74 = arith.constant dense<0.000000e+00> : vector<2x8x8xf32>
    %199 = tpu.matmul %198, %186, %cst_74 {dimension_numbers = #tpu.dot_dimension_numbers<[2], [1], [1], [2], [0, 0, 0, 1, 1, 2], [0], [0]>} : vector<2x8x8xbf16>, vector<2x8x8xbf16>, vector<2x8x8xf32> -> vector<2x8x8xf32>
    "tpu.trace_stop"() : () -> ()
    %200 = vector.shape_cast %199 : vector<2x8x8xf32> to vector<16x8xf32>
    %201 = vector.extract_strided_slice %180 {offsets = [0, 8], sizes = [16, 8], strides = [1, 1]} : vector<16x96xbf16> to vector<16x8xbf16>
    %202 = vector.shape_cast %201 : vector<16x8xbf16> to vector<2x8x8xbf16>
    %203 = vector.extract_strided_slice %180 {offsets = [0, 40], sizes = [16, 8], strides = [1, 1]} : vector<16x96xbf16> to vector<16x8xbf16>
    %204 = vector.shape_cast %203 : vector<16x8xbf16> to vector<2x8x8xbf16>
    %205 = vector.extract_strided_slice %180 {offsets = [0, 72], sizes = [16, 8], strides = [1, 1]} : vector<16x96xbf16> to vector<16x8xbf16>
    %206 = vector.shape_cast %205 : vector<16x8xbf16> to vector<2x8x8xbf16>
    "tpu.trace_start"() <{level = 10 : i32, message = "bqd,bkd->bqk"}> : () -> ()
    %cst_75 = arith.constant dense<0.000000e+00> : vector<2x8x8xf32>
    %207 = tpu.matmul %202, %204, %cst_75 {dimension_numbers = #tpu.dot_dimension_numbers<[2], [2], [1], [1], [0, 0, 0, 1, 1, 1], [0], [0]>} : vector<2x8x8xbf16>, vector<2x8x8xbf16>, vector<2x8x8xf32> -> vector<2x8x8xf32>
    "tpu.trace_stop"() : () -> ()
    %cst_76 = arith.constant dense<0xFF800000> : vector<2x8xf32>
    %208 = vector.multi_reduction <maximumf>, %207, %cst_76 [2] : vector<2x8x8xf32> to vector<2x8xf32>
    %209 = vector.shape_cast %208 : vector<2x8xf32> to vector<2x8x1xf32>
    %210 = vector.broadcast %209 : vector<2x8x1xf32> to vector<2x8x8xf32>
    %211 = arith.subf %207, %210 : vector<2x8x8xf32>
    %212 = math.exp %211 : vector<2x8x8xf32>
    %cst_77 = arith.constant dense<0.000000e+00> : vector<2x8xf32>
    %213 = vector.multi_reduction <add>, %212, %cst_77 [2] : vector<2x8x8xf32> to vector<2x8xf32>
    %214 = vector.shape_cast %213 : vector<2x8xf32> to vector<2x8x1xf32>
    %215 = tpu.reciprocal %214 {approx = true} : vector<2x8x1xf32> -> vector<2x8x1xf32>
    %216 = vector.broadcast %215 : vector<2x8x1xf32> to vector<2x8x8xf32>
    %217 = arith.mulf %212, %216 : vector<2x8x8xf32>
    %218 = arith.truncf %217 : vector<2x8x8xf32> to vector<2x8x8xbf16>
    "tpu.trace_start"() <{level = 10 : i32, message = "bqk,bkd->bqd"}> : () -> ()
    %cst_78 = arith.constant dense<0.000000e+00> : vector<2x8x8xf32>
    %219 = tpu.matmul %218, %206, %cst_78 {dimension_numbers = #tpu.dot_dimension_numbers<[2], [1], [1], [2], [0, 0, 0, 1, 1, 2], [0], [0]>} : vector<2x8x8xbf16>, vector<2x8x8xbf16>, vector<2x8x8xf32> -> vector<2x8x8xf32>
    "tpu.trace_stop"() : () -> ()
    %220 = vector.shape_cast %219 : vector<2x8x8xf32> to vector<16x8xf32>
    %221 = vector.extract_strided_slice %180 {offsets = [0, 16], sizes = [16, 8], strides = [1, 1]} : vector<16x96xbf16> to vector<16x8xbf16>
    %222 = vector.shape_cast %221 : vector<16x8xbf16> to vector<2x8x8xbf16>
    %223 = vector.extract_strided_slice %180 {offsets = [0, 48], sizes = [16, 8], strides = [1, 1]} : vector<16x96xbf16> to vector<16x8xbf16>
    %224 = vector.shape_cast %223 : vector<16x8xbf16> to vector<2x8x8xbf16>
    %225 = vector.extract_strided_slice %180 {offsets = [0, 80], sizes = [16, 8], strides = [1, 1]} : vector<16x96xbf16> to vector<16x8xbf16>
    %226 = vector.shape_cast %225 : vector<16x8xbf16> to vector<2x8x8xbf16>
    "tpu.trace_start"() <{level = 10 : i32, message = "bqd,bkd->bqk"}> : () -> ()
    %cst_79 = arith.constant dense<0.000000e+00> : vector<2x8x8xf32>
    %227 = tpu.matmul %222, %224, %cst_79 {dimension_numbers = #tpu.dot_dimension_numbers<[2], [2], [1], [1], [0, 0, 0, 1, 1, 1], [0], [0]>} : vector<2x8x8xbf16>, vector<2x8x8xbf16>, vector<2x8x8xf32> -> vector<2x8x8xf32>
    "tpu.trace_stop"() : () -> ()
    %cst_80 = arith.constant dense<0xFF800000> : vector<2x8xf32>
    %228 = vector.multi_reduction <maximumf>, %227, %cst_80 [2] : vector<2x8x8xf32> to vector<2x8xf32>
    %229 = vector.shape_cast %228 : vector<2x8xf32> to vector<2x8x1xf32>
    %230 = vector.broadcast %229 : vector<2x8x1xf32> to vector<2x8x8xf32>
    %231 = arith.subf %227, %230 : vector<2x8x8xf32>
    %232 = math.exp %231 : vector<2x8x8xf32>
    %cst_81 = arith.constant dense<0.000000e+00> : vector<2x8xf32>
    %233 = vector.multi_reduction <add>, %232, %cst_81 [2] : vector<2x8x8xf32> to vector<2x8xf32>
    %234 = vector.shape_cast %233 : vector<2x8xf32> to vector<2x8x1xf32>
    %235 = tpu.reciprocal %234 {approx = true} : vector<2x8x1xf32> -> vector<2x8x1xf32>
    %236 = vector.broadcast %235 : vector<2x8x1xf32> to vector<2x8x8xf32>
    %237 = arith.mulf %232, %236 : vector<2x8x8xf32>
    %238 = arith.truncf %237 : vector<2x8x8xf32> to vector<2x8x8xbf16>
    "tpu.trace_start"() <{level = 10 : i32, message = "bqk,bkd->bqd"}> : () -> ()
    %cst_82 = arith.constant dense<0.000000e+00> : vector<2x8x8xf32>
    %239 = tpu.matmul %238, %226, %cst_82 {dimension_numbers = #tpu.dot_dimension_numbers<[2], [1], [1], [2], [0, 0, 0, 1, 1, 2], [0], [0]>} : vector<2x8x8xbf16>, vector<2x8x8xbf16>, vector<2x8x8xf32> -> vector<2x8x8xf32>
    "tpu.trace_stop"() : () -> ()
    %240 = vector.shape_cast %239 : vector<2x8x8xf32> to vector<16x8xf32>
    %241 = vector.extract_strided_slice %180 {offsets = [0, 24], sizes = [16, 8], strides = [1, 1]} : vector<16x96xbf16> to vector<16x8xbf16>
    %242 = vector.shape_cast %241 : vector<16x8xbf16> to vector<2x8x8xbf16>
    %243 = vector.extract_strided_slice %180 {offsets = [0, 56], sizes = [16, 8], strides = [1, 1]} : vector<16x96xbf16> to vector<16x8xbf16>
    %244 = vector.shape_cast %243 : vector<16x8xbf16> to vector<2x8x8xbf16>
    %245 = vector.extract_strided_slice %180 {offsets = [0, 88], sizes = [16, 8], strides = [1, 1]} : vector<16x96xbf16> to vector<16x8xbf16>
    %246 = vector.shape_cast %245 : vector<16x8xbf16> to vector<2x8x8xbf16>
    "tpu.trace_start"() <{level = 10 : i32, message = "bqd,bkd->bqk"}> : () -> ()
    %cst_83 = arith.constant dense<0.000000e+00> : vector<2x8x8xf32>
    %247 = tpu.matmul %242, %244, %cst_83 {dimension_numbers = #tpu.dot_dimension_numbers<[2], [2], [1], [1], [0, 0, 0, 1, 1, 1], [0], [0]>} : vector<2x8x8xbf16>, vector<2x8x8xbf16>, vector<2x8x8xf32> -> vector<2x8x8xf32>
    "tpu.trace_stop"() : () -> ()
    %cst_84 = arith.constant dense<0xFF800000> : vector<2x8xf32>
    %248 = vector.multi_reduction <maximumf>, %247, %cst_84 [2] : vector<2x8x8xf32> to vector<2x8xf32>
    %249 = vector.shape_cast %248 : vector<2x8xf32> to vector<2x8x1xf32>
    %250 = vector.broadcast %249 : vector<2x8x1xf32> to vector<2x8x8xf32>
    %251 = arith.subf %247, %250 : vector<2x8x8xf32>
    %252 = math.exp %251 : vector<2x8x8xf32>
    %cst_85 = arith.constant dense<0.000000e+00> : vector<2x8xf32>
    %253 = vector.multi_reduction <add>, %252, %cst_85 [2] : vector<2x8x8xf32> to vector<2x8xf32>
    %254 = vector.shape_cast %253 : vector<2x8xf32> to vector<2x8x1xf32>
    %255 = tpu.reciprocal %254 {approx = true} : vector<2x8x1xf32> -> vector<2x8x1xf32>
    %256 = vector.broadcast %255 : vector<2x8x1xf32> to vector<2x8x8xf32>
    %257 = arith.mulf %252, %256 : vector<2x8x8xf32>
    %258 = arith.truncf %257 : vector<2x8x8xf32> to vector<2x8x8xbf16>
    "tpu.trace_start"() <{level = 10 : i32, message = "bqk,bkd->bqd"}> : () -> ()
    %cst_86 = arith.constant dense<0.000000e+00> : vector<2x8x8xf32>
    %259 = tpu.matmul %258, %246, %cst_86 {dimension_numbers = #tpu.dot_dimension_numbers<[2], [1], [1], [2], [0, 0, 0, 1, 1, 2], [0], [0]>} : vector<2x8x8xbf16>, vector<2x8x8xbf16>, vector<2x8x8xf32> -> vector<2x8x8xf32>
    "tpu.trace_stop"() : () -> ()
    %260 = vector.shape_cast %259 : vector<2x8x8xf32> to vector<16x8xf32>
    %261 = tpu.concatenate %200, %220, %240, %260 in 1 : vector<16x8xf32>, vector<16x8xf32>, vector<16x8xf32>, vector<16x8xf32> -> vector<16x32xf32>
    %262 = arith.truncf %261 : vector<16x32xf32> to vector<16x32xbf16>
    %c1_87 = arith.constant 1 : index
    %c0_88 = arith.constant 0 : index
    %c0_89 = arith.constant 0 : index
    %263 = vector.load %arg4[%c1_87, %c0_88, %c0_89] : memref<2x32x32xbf16, #tpu.memory_space<vmem>>, vector<1x32x32xbf16>
    %264 = vector.shape_cast %263 : vector<1x32x32xbf16> to vector<32x32xbf16>
    %cst_90 = arith.constant dense<0.000000e+00> : vector<16x32xf32>
    %265 = tpu.matmul %262, %264, %cst_90 {dimension_numbers = #tpu.dot_dimension_numbers<[1], [0], [0], [1], [0, 0, 1, 1], [], []>} : vector<16x32xbf16>, vector<32x32xbf16>, vector<16x32xf32> -> vector<16x32xf32>
    %c1_91 = arith.constant 1 : index
    %c0_92 = arith.constant 0 : index
    %c0_93 = arith.constant 0 : index
    %266 = vector.load %arg6[%c1_91, %c0_92, %c0_93] : memref<2x7x32xf32, #tpu.memory_space<vmem>>, vector<1x1x32xf32>
    %267 = vector.shape_cast %266 : vector<1x1x32xf32> to vector<1x32xf32>
    %268 = vector.broadcast %267 : vector<1x32xf32> to vector<16x32xf32>
    %269 = arith.addf %265, %268 : vector<16x32xf32>
    %270 = arith.addf %171, %269 : vector<16x32xf32>
    %c1_94 = arith.constant 1 : index
    %c1_95 = arith.constant 1 : index
    %c0_96 = arith.constant 0 : index
    %271 = vector.load %arg6[%c1_94, %c1_95, %c0_96] : memref<2x7x32xf32, #tpu.memory_space<vmem>>, vector<1x1x32xf32>
    %272 = vector.shape_cast %271 : vector<1x1x32xf32> to vector<1x32xf32>
    %c1_97 = arith.constant 1 : index
    %c2_98 = arith.constant 2 : index
    %c0_99 = arith.constant 0 : index
    %273 = vector.load %arg6[%c1_97, %c2_98, %c0_99] : memref<2x7x32xf32, #tpu.memory_space<vmem>>, vector<1x1x32xf32>
    %274 = vector.shape_cast %273 : vector<1x1x32xf32> to vector<1x32xf32>
    %cst_100 = arith.constant dense<0.000000e+00> : vector<16xf32>
    %275 = vector.multi_reduction <add>, %270, %cst_100 [1] : vector<16x32xf32> to vector<16xf32>
    %276 = vector.shape_cast %275 : vector<16xf32> to vector<16x1xf32>
    %cst_101 = arith.constant 3.200000e+01 : f32
    %277 = vector.broadcast %cst_101 : f32 to vector<16x1xf32>
    %278 = arith.divf %276, %277 : vector<16x1xf32>
    %279 = vector.broadcast %278 : vector<16x1xf32> to vector<16x32xf32>
    %280 = arith.subf %270, %279 : vector<16x32xf32>
    %281 = arith.mulf %280, %280 : vector<16x32xf32>
    %cst_102 = arith.constant dense<0.000000e+00> : vector<16xf32>
    %282 = vector.multi_reduction <add>, %281, %cst_102 [1] : vector<16x32xf32> to vector<16xf32>
    %283 = vector.shape_cast %282 : vector<16xf32> to vector<16x1xf32>
    %cst_103 = arith.constant 3.200000e+01 : f32
    %284 = vector.broadcast %cst_103 : f32 to vector<16x1xf32>
    %285 = arith.divf %283, %284 : vector<16x1xf32>
    %286 = vector.broadcast %278 : vector<16x1xf32> to vector<16x32xf32>
    %287 = arith.subf %270, %286 : vector<16x32xf32>
    %cst_104 = arith.constant 9.99999974E-6 : f32
    %288 = vector.broadcast %cst_104 : f32 to vector<16x1xf32>
    %289 = arith.addf %285, %288 : vector<16x1xf32>
    %290 = math.rsqrt %289 : vector<16x1xf32>
    %291 = vector.broadcast %290 : vector<16x1xf32> to vector<16x32xf32>
    %292 = arith.mulf %287, %291 : vector<16x32xf32>
    %293 = vector.broadcast %272 : vector<1x32xf32> to vector<16x32xf32>
    %294 = arith.mulf %292, %293 : vector<16x32xf32>
    %295 = vector.broadcast %274 : vector<1x32xf32> to vector<16x32xf32>
    %296 = arith.addf %294, %295 : vector<16x32xf32>
    %297 = arith.truncf %296 : vector<16x32xf32> to vector<16x32xbf16>
    %c1_105 = arith.constant 1 : index
    %c0_106 = arith.constant 0 : index
    %c0_107 = arith.constant 0 : index
    %c0_108 = arith.constant 0 : index
    %298 = vector.load %arg5[%c1_105, %c0_106, %c0_107, %c0_108] : memref<2x2x32x32xbf16, #tpu.memory_space<vmem>>, vector<1x1x32x32xbf16>
    %299 = vector.shape_cast %298 : vector<1x1x32x32xbf16> to vector<32x32xbf16>
    %cst_109 = arith.constant dense<0.000000e+00> : vector<16x32xf32>
    %300 = tpu.matmul %297, %299, %cst_109 {dimension_numbers = #tpu.dot_dimension_numbers<[1], [0], [0], [1], [0, 0, 1, 1], [], []>} : vector<16x32xbf16>, vector<32x32xbf16>, vector<16x32xf32> -> vector<16x32xf32>
    %c1_110 = arith.constant 1 : index
    %c3_111 = arith.constant 3 : index
    %c0_112 = arith.constant 0 : index
    %301 = vector.load %arg6[%c1_110, %c3_111, %c0_112] : memref<2x7x32xf32, #tpu.memory_space<vmem>>, vector<1x1x32xf32>
    %302 = vector.shape_cast %301 : vector<1x1x32xf32> to vector<1x32xf32>
    %303 = vector.broadcast %302 : vector<1x32xf32> to vector<16x32xf32>
    %304 = arith.addf %300, %303 : vector<16x32xf32>
    %cst_113 = arith.constant 0.000000e+00 : f32
    %305 = vector.broadcast %cst_113 : f32 to vector<16x32xf32>
    %306 = arith.maximumf %304, %305 : vector<16x32xf32>
    %307 = arith.truncf %306 : vector<16x32xf32> to vector<16x32xbf16>
    %c1_114 = arith.constant 1 : index
    %c1_115 = arith.constant 1 : index
    %c0_116 = arith.constant 0 : index
    %c0_117 = arith.constant 0 : index
    %308 = vector.load %arg5[%c1_114, %c1_115, %c0_116, %c0_117] : memref<2x2x32x32xbf16, #tpu.memory_space<vmem>>, vector<1x1x32x32xbf16>
    %309 = vector.shape_cast %308 : vector<1x1x32x32xbf16> to vector<32x32xbf16>
    %cst_118 = arith.constant dense<0.000000e+00> : vector<16x32xf32>
    %310 = tpu.matmul %307, %309, %cst_118 {dimension_numbers = #tpu.dot_dimension_numbers<[1], [0], [0], [1], [0, 0, 1, 1], [], []>} : vector<16x32xbf16>, vector<32x32xbf16>, vector<16x32xf32> -> vector<16x32xf32>
    %c1_119 = arith.constant 1 : index
    %c4_120 = arith.constant 4 : index
    %c0_121 = arith.constant 0 : index
    %311 = vector.load %arg6[%c1_119, %c4_120, %c0_121] : memref<2x7x32xf32, #tpu.memory_space<vmem>>, vector<1x1x32xf32>
    %312 = vector.shape_cast %311 : vector<1x1x32xf32> to vector<1x32xf32>
    %313 = vector.broadcast %312 : vector<1x32xf32> to vector<16x32xf32>
    %314 = arith.addf %310, %313 : vector<16x32xf32>
    %315 = arith.addf %296, %314 : vector<16x32xf32>
    %c1_122 = arith.constant 1 : index
    %c5_123 = arith.constant 5 : index
    %c0_124 = arith.constant 0 : index
    %316 = vector.load %arg6[%c1_122, %c5_123, %c0_124] : memref<2x7x32xf32, #tpu.memory_space<vmem>>, vector<1x1x32xf32>
    %317 = vector.shape_cast %316 : vector<1x1x32xf32> to vector<1x32xf32>
    %c1_125 = arith.constant 1 : index
    %c6_126 = arith.constant 6 : index
    %c0_127 = arith.constant 0 : index
    %318 = vector.load %arg6[%c1_125, %c6_126, %c0_127] : memref<2x7x32xf32, #tpu.memory_space<vmem>>, vector<1x1x32xf32>
    %319 = vector.shape_cast %318 : vector<1x1x32xf32> to vector<1x32xf32>
    %cst_128 = arith.constant dense<0.000000e+00> : vector<16xf32>
    %320 = vector.multi_reduction <add>, %315, %cst_128 [1] : vector<16x32xf32> to vector<16xf32>
    %321 = vector.shape_cast %320 : vector<16xf32> to vector<16x1xf32>
    %cst_129 = arith.constant 3.200000e+01 : f32
    %322 = vector.broadcast %cst_129 : f32 to vector<16x1xf32>
    %323 = arith.divf %321, %322 : vector<16x1xf32>
    %324 = vector.broadcast %323 : vector<16x1xf32> to vector<16x32xf32>
    %325 = arith.subf %315, %324 : vector<16x32xf32>
    %326 = arith.mulf %325, %325 : vector<16x32xf32>
    %cst_130 = arith.constant dense<0.000000e+00> : vector<16xf32>
    %327 = vector.multi_reduction <add>, %326, %cst_130 [1] : vector<16x32xf32> to vector<16xf32>
    %328 = vector.shape_cast %327 : vector<16xf32> to vector<16x1xf32>
    %cst_131 = arith.constant 3.200000e+01 : f32
    %329 = vector.broadcast %cst_131 : f32 to vector<16x1xf32>
    %330 = arith.divf %328, %329 : vector<16x1xf32>
    %331 = vector.broadcast %323 : vector<16x1xf32> to vector<16x32xf32>
    %332 = arith.subf %315, %331 : vector<16x32xf32>
    %cst_132 = arith.constant 9.99999974E-6 : f32
    %333 = vector.broadcast %cst_132 : f32 to vector<16x1xf32>
    %334 = arith.addf %330, %333 : vector<16x1xf32>
    %335 = math.rsqrt %334 : vector<16x1xf32>
    %336 = vector.broadcast %335 : vector<16x1xf32> to vector<16x32xf32>
    %337 = arith.mulf %332, %336 : vector<16x32xf32>
    %338 = vector.broadcast %317 : vector<1x32xf32> to vector<16x32xf32>
    %339 = arith.mulf %337, %338 : vector<16x32xf32>
    %340 = vector.broadcast %319 : vector<1x32xf32> to vector<16x32xf32>
    %341 = arith.addf %339, %340 : vector<16x32xf32>
    %342 = vector.shape_cast %341 : vector<16x32xf32> to vector<2x8x32xf32>
    %cst_133 = arith.constant dense<0.000000e+00> : vector<2x32xf32>
    %343 = vector.multi_reduction <add>, %342, %cst_133 [1] : vector<2x8x32xf32> to vector<2x32xf32>
    %cst_134 = arith.constant 8.000000e+00 : f32
    %344 = vector.broadcast %cst_134 : f32 to vector<2x32xf32>
    %345 = arith.divf %343, %344 : vector<2x32xf32>
    %346 = arith.truncf %345 : vector<2x32xf32> to vector<2x32xbf16>
    %c0_135 = arith.constant 0 : index
    %c0_136 = arith.constant 0 : index
    %347 = vector.load %arg7[%c0_135, %c0_136] : memref<32x64xbf16, #tpu.memory_space<vmem>>, vector<32x64xbf16>
    %cst_137 = arith.constant dense<0.000000e+00> : vector<2x64xf32>
    %348 = tpu.matmul %346, %347, %cst_137 {dimension_numbers = #tpu.dot_dimension_numbers<[1], [0], [0], [1], [0, 0, 1, 1], [], []>} : vector<2x32xbf16>, vector<32x64xbf16>, vector<2x64xf32> -> vector<2x64xf32>
    %c0_138 = arith.constant 0 : index
    %c0_139 = arith.constant 0 : index
    %349 = vector.load %arg8[%c0_138, %c0_139] : memref<3x64xf32, #tpu.memory_space<vmem>>, vector<1x64xf32>
    %350 = vector.broadcast %349 : vector<1x64xf32> to vector<2x64xf32>
    %351 = arith.addf %348, %350 : vector<2x64xf32>
    %cst_140 = arith.constant 0.000000e+00 : f32
    %352 = vector.broadcast %cst_140 : f32 to vector<2x64xf32>
    %353 = arith.maximumf %351, %352 : vector<2x64xf32>
    %c1_141 = arith.constant 1 : index
    %c0_142 = arith.constant 0 : index
    %354 = vector.load %arg8[%c1_141, %c0_142] : memref<3x64xf32, #tpu.memory_space<vmem>>, vector<1x64xf32>
    %355 = vector.broadcast %354 : vector<1x64xf32> to vector<2x64xf32>
    %356 = arith.mulf %353, %355 : vector<2x64xf32>
    %cst_143 = arith.constant dense<0.000000e+00> : vector<2xf32>
    %357 = vector.multi_reduction <add>, %356, %cst_143 [1] : vector<2x64xf32> to vector<2xf32>
    %358 = vector.shape_cast %357 : vector<2xf32> to vector<1x2xf32>
    %c2_144 = arith.constant 2 : index
    %c0_145 = arith.constant 0 : index
    %359 = vector.load %arg8[%c2_144, %c0_145] : memref<3x64xf32, #tpu.memory_space<vmem>>, vector<1x1xf32>
    %360 = vector.broadcast %359 : vector<1x1xf32> to vector<1x2xf32>
    %361 = arith.addf %358, %360 : vector<1x2xf32>
    %c0_146 = arith.constant 0 : index
    %c0_147 = arith.constant 0 : index
    %c0_148 = arith.constant 0 : index
    %362 = vector.load %arg9[%c0_146, %c0_147, %c0_148] : memref<1x1x2xf32, #tpu.memory_space<vmem>>, vector<1x1x2xf32>
    %363 = vector.shape_cast %362 : vector<1x1x2xf32> to vector<1x2xf32>
    %364 = vector.shape_cast %361 : vector<1x2xf32> to vector<1x1x2xf32>
    tpu.vector_store %arg9[%c0_146, %c0_147, %c0_148], %364 {strides = array<i32>} : memref<1x1x2xf32, #tpu.memory_space<vmem>>, vector<1x1x2xf32>,
    return
  }
  func.func @transform_0(%arg0: i32) -> (i32, i32, i32) {
    %c0_i32 = arith.constant 0 : i32
    %c0_i32_0 = arith.constant 0 : i32
    %c0_i32_1 = arith.constant 0 : i32
    return %arg0, %c0_i32, %c0_i32_0 : i32, i32, i32
  }
  func.func @transform_1(%arg0: i32) -> (i32, i32, i32) {
    %c0_i32 = arith.constant 0 : i32
    %c0_i32_0 = arith.constant 0 : i32
    %c0_i32_1 = arith.constant 0 : i32
    %c0_i32_2 = arith.constant 0 : i32
    return %c0_i32, %c0_i32_0, %c0_i32_1 : i32, i32, i32
  }
  func.func @transform_2(%arg0: i32) -> (i32, i32, i32) {
    %c0_i32 = arith.constant 0 : i32
    %c0_i32_0 = arith.constant 0 : i32
    %c0_i32_1 = arith.constant 0 : i32
    %c0_i32_2 = arith.constant 0 : i32
    return %c0_i32, %c0_i32_0, %c0_i32_1 : i32, i32, i32
  }
  func.func @transform_3(%arg0: i32) -> (i32, i32, i32) {
    %c0_i32 = arith.constant 0 : i32
    %c0_i32_0 = arith.constant 0 : i32
    %c0_i32_1 = arith.constant 0 : i32
    %c0_i32_2 = arith.constant 0 : i32
    return %c0_i32, %c0_i32_0, %c0_i32_1 : i32, i32, i32
  }
  func.func @transform_4(%arg0: i32) -> (i32, i32, i32, i32) {
    %c0_i32 = arith.constant 0 : i32
    %c0_i32_0 = arith.constant 0 : i32
    %c0_i32_1 = arith.constant 0 : i32
    %c0_i32_2 = arith.constant 0 : i32
    %c0_i32_3 = arith.constant 0 : i32
    return %c0_i32, %c0_i32_0, %c0_i32_1, %c0_i32_2 : i32, i32, i32, i32
  }
  func.func @transform_5(%arg0: i32) -> (i32, i32, i32) {
    %c0_i32 = arith.constant 0 : i32
    %c0_i32_0 = arith.constant 0 : i32
    %c0_i32_1 = arith.constant 0 : i32
    %c0_i32_2 = arith.constant 0 : i32
    return %c0_i32, %c0_i32_0, %c0_i32_1 : i32, i32, i32
  }
  func.func @transform_6(%arg0: i32) -> (i32, i32) {
    %c0_i32 = arith.constant 0 : i32
    %c0_i32_0 = arith.constant 0 : i32
    %c0_i32_1 = arith.constant 0 : i32
    return %c0_i32, %c0_i32_0 : i32, i32
  }
  func.func @transform_7(%arg0: i32) -> (i32, i32) {
    %c0_i32 = arith.constant 0 : i32
    %c0_i32_0 = arith.constant 0 : i32
    %c0_i32_1 = arith.constant 0 : i32
    return %c0_i32, %c0_i32_0 : i32, i32
  }
  func.func @transform_8(%arg0: i32) -> (i32, i32, i32) {
    %c0_i32 = arith.constant 0 : i32
    %c0_i32_0 = arith.constant 0 : i32
    %c0_i32_1 = arith.constant 0 : i32
    return %arg0, %c0_i32, %c0_i32_0 : i32, i32, i32
  }
}

</mosaic_0001>

<bundles_post_ra>
// kernel: tpu_custom_call.1
= control target key start
LH: loop header
LB: loop body
LE: loop exit
PB: predicated region body
PF: predicated region fallthrough
CT: control target
= control target key end

     0   :  { %13 = vsyncpa [#allocation3], 0  ;;  %s4120_s0 = inlined_call_operand.hbm [shape: f32[2,8,32], index: 0, kind: input, shape index: {}]   ;;  %s4121_s1 = inlined_call_operand.vmem [shape: bf16[2,32,96], index: 1, kind: input, shape index: {}]   ;;  %s4122_s2 = inlined_call_operand.hbm [shape: f32[2,1,96], index: 2, kind: input, shape index: {}]   ;;  %s4123_s3 = inlined_call_operand.hbm [shape: bf16[2,32,32], index: 3, kind: input, shape index: {}]   ;;  %s4124_s4 = inlined_call_operand.hbm [shape: bf16[2,2,32,32], index: 4, kind: input, shape index: {}]   ;;  %s4125_s5 = inlined_call_operand.vmem [shape: f32[2,7,32], index: 5, kind: input, shape index: {}]   ;;  %s4126_s6 = inlined_call_operand.vmem [shape: bf16[32,64], index: 6, kind: input, shape index: {}]   ;;  %s4127_s7 = inlined_call_operand.vmem [shape: f32[3,64], index: 7, kind: input, shape index: {}]   ;;  %s4128_s8 = inlined_call_operand.hbm [shape: f32[1,1,2], index: 8, kind: output, shape index: {}]  }
   0x1   :  { %14 = vsyncpa [#allocation6], 0 }
   0x2   :  { %15 = vsyncpa [#allocation9], 0 }
   0x3   :  { %16 = vsyncpa [#allocation4], 0  ;;  %s3495_s27 = smov [#allocation5]   ;;  %s3377_s9 = scalar_lea.hbm %s4122_s2, 32 }
   0x4   :  { %s36_s28 = sshll.u32 %s3495_s27, 4  ;;  %p3378_p0 = scmp.ne.s32.totalorder %s4122_s2, %s3377_s9  ;;  %s37_s28 = int_to_ptr.vmem [resolvable:$true] %s36_s28 }
   0x5   :  { %p3381_p1 = scmp.lt.u32.totalorder %s3377_s9, %s4122_s2 }
   0x7   :  { %p3383_p2 = pnand %p3381_p1, %p3378_p0 }
   0x9   :  { %3386 = shalt.err (!%p3383_p2)
}
   0xa   :  { %s3387_s14 = scalar_lea.vmem %s37_s28, 32  ;;  %p3392_p4 = scmp.lt.s32.totalorder %s37_s28, %s37_s28 }
   0xb   :  { %p3388_p3 = scmp.ne.s32.totalorder %s37_s28, %s3387_s14  ;;  %p3393_p5 = scmp.lt.s32.totalorder %s3387_s14, %s3387_s14 }
   0xd   :  { %p3394_p6 = por %p3393_p5, %p3392_p4 }
   0xf   :  { %p3395_p7 = pnand %p3394_p6, %p3388_p3 }
  0x11   :  { %3398 = shalt.err (!%p3395_p7)
}
  0x12   :  { %s3496_s15 = smov 16   ;;  %s3497_s16 = smov 1  }
  0x13   :  { %42 = dma.hbm_to_vmem [thread:$0]  %s4122_s2, 32, %s37_s28, [#allocation6], %s3496_s15, %s3496_s15, %s3497_s16  }
  0x14   :  { %s3498_s19 = smov [#allocation2]   ;;  %s3399_s23 = scalar_lea.hbm %s4120_s0, 256 }
  0x15   :  { %s22_s20 = sshll.u32 %s3498_s19, 4  ;;  %p3400_p8 = scmp.ne.s32.totalorder %s4120_s0, %s3399_s23  ;;  %s23_s20 = int_to_ptr.vmem [resolvable:$true] %s22_s20 }
  0x16   :  { %p3403_p9 = scmp.lt.u32.totalorder %s3399_s23, %s4120_s0 }
  0x18   :  { %p3405_p10 = pnand %p3403_p9, %p3400_p8 }
  0x1a   :  { %3408 = shalt.err (!%p3405_p10)
}
  0x1b   :  { %s3409_s29 = scalar_lea.vmem %s23_s20, 256  ;;  %p3414_p12 = scmp.lt.s32.totalorder %s23_s20, %s23_s20 }
  0x1c   :  { %p3410_p11 = scmp.ne.s32.totalorder %s23_s20, %s3409_s29  ;;  %p3415_p13 = scmp.lt.s32.totalorder %s3409_s29, %s3409_s29 }
  0x1e   :  { %p3416_p0 = por %p3415_p13, %p3414_p12 }
  0x20   :  { %p3417_p1 = pnand %p3416_p0, %p3410_p11 }
  0x22   :  { %3420 = shalt.err (!%p3417_p1)
}
  0x23   :  { %s3499_s2 = smov 128   ;;  %s3500_s28 = smov 8  }
  0x24   :  { %28 = dma.hbm_to_vmem [thread:$0]  %s4120_s0, 256, %s23_s20, [#allocation3], %s3499_s2, %s3499_s2, %s3500_s28  }
  0x25   :  { %s3501_s10 = smov [#allocation7]   ;;  %s3421_s14 = scalar_lea.hbm %s4123_s3, 512 }
  0x26   :  { %s48_s11 = sshll.u32 %s3501_s10, 4  ;;  %p3422_p2 = scmp.ne.s32.totalorder %s4123_s3, %s3421_s14  ;;  %s49_s11 = int_to_ptr.vmem [resolvable:$true] %s48_s11 }
  0x27   :  { %p3425_p3 = scmp.lt.u32.totalorder %s3421_s14, %s4123_s3 }
  0x29   :  { %p3427_p4 = pnand %p3425_p3, %p3422_p2 }
  0x2b   :  { %3430 = shalt.err (!%p3427_p4)
}
  0x2c   :  { %s3431_s21 = scalar_lea.vmem %s49_s11, 512  ;;  %p3436_p6 = scmp.lt.s32.totalorder %s49_s11, %s49_s11 }
  0x2d   :  { %p3432_p5 = scmp.ne.s32.totalorder %s49_s11, %s3431_s21  ;;  %p3437_p7 = scmp.lt.s32.totalorder %s3431_s21, %s3431_s21 }
  0x2f   :  { %p3438_p8 = por %p3437_p7, %p3436_p6 }
  0x31   :  { %p3439_p9 = pnand %p3438_p8, %p3432_p5 }
  0x33   :  { %3442 = shalt.err (!%p3439_p9)
}
  0x34   :  { %s3502_s0 = smov 64   ;;  %s3503_s20 = smov 4  }
  0x35   :  { %54 = dma.hbm_to_vmem [thread:$0]  %s4123_s3, 512, %s49_s11, [#allocation6], %s3502_s0, %s3502_s0, %s3503_s20  }
  0x36   :  { %s3504_s24 = smov [#allocation8]   ;;  %s3443_s29 = scalar_lea.hbm %s4124_s4, 1024 }
  0x37   :  { %s60_s25 = sshll.u32 %s3504_s24, 4  ;;  %p3444_p10 = scmp.ne.s32.totalorder %s4124_s4, %s3443_s29  ;;  %s61_s25 = int_to_ptr.vmem [resolvable:$true] %s60_s25 }
  0x38   :  { %p3447_p11 = scmp.lt.u32.totalorder %s3443_s29, %s4124_s4 }
  0x3a   :  { %p3449_p12 = pnand %p3447_p11, %p3444_p10 }
  0x3c   :  { %3452 = shalt.err (!%p3449_p12)
}
  0x3d   :  { %s3453_s12 = scalar_lea.vmem %s61_s25, 1024  ;;  %p3458_p0 = scmp.lt.s32.totalorder %s61_s25, %s61_s25 }
  0x3e   :  { %p3454_p13 = scmp.ne.s32.totalorder %s61_s25, %s3453_s12  ;;  %p3459_p1 = scmp.lt.s32.totalorder %s3453_s12, %s3453_s12 }
  0x40   :  { %p3460_p2 = por %p3459_p1, %p3458_p0 }
  0x42   :  { %p3461_p3 = pnand %p3460_p2, %p3454_p13 }
  0x44   :  { %3464 = shalt.err (!%p3461_p3)
}
  0x45   :  { %66 = dma.hbm_to_vmem [thread:$0]  %s4124_s4, 1024, %s61_s25, [#allocation9], %s3502_s0, %s3502_s0, %s3503_s20  }
  0x46   :  { %3487 = dma.done.wait [#allocation3], 256  }
  0x47   :  { %3488 = vsyncadd [#allocation3], 4294967040 }
  0x48   :  { %3489 = dma.done.wait [#allocation6], 544  }
  0x49   :  { %3490 = vsyncadd [#allocation6], 4294966752 }
  0x4a   :  { %3491 = dma.done.wait [#allocation9], 1024  }
  0x4b   :  { %3492 = vsyncadd [#allocation9], 4294966272  ;;  %v3505_v0 = vmov 0.0   ;;  %vm3506_vm0 = vmmov 0   ;;  %v3279_v1 = vld [vmem:[%s4121_s1] sm:$0xff]   ;;  %v3280_v2 = vld [vmem:[%s4121_s1 + $0x8] sm:$0xff]  }
  0x4c   :  { %2958 = vmatprep.subr.bf16.mxu0 %v3505_v0  ;;  %2962 = vmatprep.mubr.msk.bf16.mxu0 %vm3506_vm0, %v3505_v0  ;;  %v3632_v3 = vld [vmem:[#allocation2] sm:$0xff]  ;;  %v3634_v4 = vld [vmem:[#allocation2 + $0x8] sm:$0xff]  ;;  %vm112_vm1 = vcmask 261120   ;;  %v2771_v6 = vld [vmem:[#allocation5] ss:$0 sm:$0xff]  ;;  %s3507_s17 = smov 96  }
  0x4d   :  { %2966 = vmatprep.subr.bf16.mxu1 %v3505_v0  ;;  %2968 = vmatprep.mubr.msk.bf16.mxu1 %vm3506_vm0, %v3505_v0  ;;  %v88_v5 = vpack.c.bf16 %v3634_v4, %v3632_v3  ;;  %vm165_vm2 = vcmask 64512   ;;  %s3508_s18 = smov 88   ;;  %vm289_vm3 = vcmask 1043456   ;;  %s3509_s19 = smov 120   ;;  %vm1067_vm4 = vcmask 130048  }
  0x4e   :  { %2959 = vmatpush3.bf16.msra.mxu0 %v3279_v1  ;;  %s3510_s21 = smov 56   ;;  %s3511_s20 = smov 80   ;;  %vm1070_vm5 = vcmask 195584   ;;  %vm2661_vm6 = vcmask 1041409   ;;  %vm2726_vm7 = vcmask 517120   ;;  %vm2752_vm8 = vcmask 8192  }
  0x4f   :  { %2960 = vmatprep.subr.bf16.mxu0 %v3505_v0  ;;  %s3512_s22 = smov 112   ;;  %s3513_s23 = smov 48  }
  0x50   :  { %s3514_s24 = smov 72   ;;  %s3515_s25 = smov 104  }
  0x51   :  { %s3516_s26 = smov 40   ;;  %s3517_s27 = smov 24  }
  0x52   :  { %2961 = vmatpush3.bf16.msra.mxu0 %v3280_v2  ;;  %s3519_s2 = smov [#allocation10]  }
  0x53   :  { %2972 = vmatprep.subr.bf16.mxu0 %v3505_v0  ;;  %s2760_s30 = sshll.u32 %s3519_s2, 4  ;;  %s2761_s30 = int_to_ptr.vmem [resolvable:$true] %s2760_s30 }
  0x54   :  { %s3469_s9 = scalar_lea.vmem %s2761_s30, 32  ;;  %p3470_p5 = scmp.lt.s32.totalorder %s2761_s30, %s2761_s30 }
  0x55   :  { %2963 = vmatmul.mubr.msk.bf16.vlgmr.msra.gmra.mrb[0].mxu0 %vm112_vm1, %v88_v5 }
  0x56   :  { %2974 = vmatprep.mubr.msk.bf16.mxu0 %vm3506_vm0, %v3505_v0 }
 0x128   :  { %v150_v7 = vpop.f32.mrb[0].mxu0 }
 0x129   :  { %v151_v8 = vadd.f32 %v2771_v6, %v150_v7  ;;  %v2964_v9 = vpop.f32.mrb[1].mxu0 }
 0x12a   :  { %v153_v10 = vpop.f32.mrb[2].mxu0 }
 0x12b   :  { %v3643_v11 = vpack.c.bf16 %v151_v8, %v151_v8  ;;  %v154_v12 = vadd.f32 %v2771_v6, %v153_v10  ;;  %v2965_v13 = vpop.f32.mrb[3].mxu0 }
 0x12d   :  { %163 = vrot.lane.b32.xlu0 %v3643_v11, %s3507_s17  ;;  %v3647_v14 = vpack.c.bf16 %v154_v12, %v154_v12 }
 0x131   :  { %212 = vrot.lane.b32.xlu0 %v3647_v14, %s3507_s17 }
 0x19f   :  { %v164_v15 = vpop.permute.xlu0 %163 }
 0x1a0   :  { %v170_v16 = vsel %vm165_vm2, %v164_v15, 0 }
 0x1a1   :  { %2967 = vmatpush3.bf16.xpose.msra.mxu1 %v170_v16 }
 0x1a2   :  { %2978 = vmatprep.subr.bf16.mxu1 %v3505_v0 }
 0x1a3   :  { %v213_v17 = vpop.permute.xlu0 %212 }
 0x1a4   :  { %v218_v18 = vsel %vm165_vm2, %v213_v17, 0 }
 0x1a5   :  { %2973 = vmatpush3.bf16.xpose.msra.mxu0 %v218_v18 }
 0x1a6   :  { %2984 = vmatprep.subr.bf16.mxu0 %v3505_v0 }
 0x1a8   :  { %2969 = vmatmul.mubr.msk.bf16.vlgmr.msra.gmra.mrb[0].mxu1 %vm165_vm2, %v3643_v11 }
 0x1a9   :  { %2980 = vmatprep.mubr.msk.bf16.mxu1 %vm3506_vm0, %v3505_v0 }
 0x1ac   :  { %2975 = vmatmul.mubr.msk.bf16.vlgmr.msra.gmra.mrb[4].mxu0 %vm165_vm2, %v3647_v14 }
 0x1ad   :  { %2986 = vmatprep.mubr.msk.bf16.mxu0 %vm3506_vm0, %v3505_v0 }
 0x27b   :  { %v206_v19 = vpop.f32.mrb[0].mxu1 }
 0x27c   :  { %v2970_v20 = vpop.f32.mrb[1].mxu1  ;;  %v260_v21 = vsel %vm165_vm2, %v206_v19, -inf }
 0x27d   :  { %261 = vmax.xlane.f32.xlu1 %v260_v21  ;;  %v209_v22 = vpop.f32.mrb[2].mxu1 }
 0x27e   :  { %v2971_v23 = vpop.f32.mrb[3].mxu1 }
 0x27f   :  { %v254_v24 = vpop.f32.mrb[4].mxu0 }
 0x280   :  { %v2976_v25 = vpop.f32.mrb[5].mxu0  ;;  %v263_v26 = vsel %vm165_vm2, %v254_v24, -inf }
 0x281   :  { %264 = vmax.xlane.f32.xlu1 %v263_v26  ;;  %v257_v27 = vpop.f32.mrb[6].mxu0 }
 0x282   :  { %v2977_v28 = vpop.f32.mrb[7].mxu0 }
 0x292   :  { %284 = vrot.lane.b32.xlu1 %v3643_v11, %s3502_s0 }
 0x296   :  { %333 = vrot.lane.b32.xlu1 %v3647_v14, %s3502_s0 }
 0x29a   :  { %383 = vrot.lane.b32.xlu1 %v3643_v11, %s3508_s18 }
 0x30a   :  { %v262_v29 = vpop.xlane.xlu1 %261 }
 0x30b   :  { %v266_v30 = vsub.f32 %v206_v19, %v262_v29 }
 0x30d   :  { %v268_v31 = vmul.f32 1.442695, %v266_v30 }
 0x30e   :  { %v265_v32 = vpop.xlane.xlu1 %264 }
 0x30f   :  { %3297 = vpow2.f32 %v268_v31  ;;  %v267_v33 = vsub.f32 %v254_v24, %v265_v32 }
 0x311   :  { %v270_v34 = vmul.f32 1.442695, %v267_v33 }
 0x312   :  { %v285_v35 = vpop.permute.xlu1 %284 }
 0x313   :  { %3299 = vpow2.f32 %v270_v34  ;;  %v291_v36 = vsel %vm289_vm3, %v285_v35, 0 }
 0x314   :  { %2979 = vmatpush3.bf16.msra.mxu1 %v291_v36 }
 0x315   :  { %2990 = vmatprep.subr.bf16.mxu1 %v3505_v0 }
 0x316   :  { %v334_v37 = vpop.permute.xlu1 %333 }
 0x317   :  { %v339_v38 = vsel %vm289_vm3, %v334_v37, 0 }
 0x318   :  { %2985 = vmatpush3.bf16.msra.mxu0 %v339_v38 }
 0x319   :  { %v3298_v39 = vpop.eup %3297  ;;  %2996 = vmatprep.subr.bf16.mxu0 %v3505_v0 }
 0x31a   :  { %v272_v40 = vsel %vm165_vm2, %v3298_v39, 0.0  ;;  %v384_v43 = vpop.permute.xlu1 %383 }
 0x31b   :  { %273 = vadd.xlane.f32.xlu0 %v272_v40  ;;  %v389_v50 = vsel %vm165_vm2, %v384_v43, 0 }
 0x31d   :  { %v3300_v41 = vpop.eup %3299 }
 0x31e   :  { %v275_v42 = vsel %vm165_vm2, %v3300_v41, 0.0 }
 0x31f   :  { %276 = vadd.xlane.f32.xlu1 %v275_v42 }
 0x330   :  { %433 = vrot.lane.b32.xlu1 %v3647_v14, %s3508_s18 }
 0x331   :  { %381 = vrot.lane.b32.xlu0 %v3643_v11, %s3509_s19 }
 0x334   :  { %431 = vrot.lane.b32.xlu1 %v3647_v14, %s3509_s19 }
 0x3a8   :  { %v274_v44 = vpop.xlane.xlu0 %273 }
 0x3a9   :  { %3301 = vrcp.f32 %v274_v44 }
 0x3ac   :  { %v277_v45 = vpop.xlane.xlu1 %276  ;;  %v382_v55 = vpop.permute.xlu0 %381 }
 0x3ad   :  { %3303 = vrcp.f32 %v277_v45 }
 0x3b0   :  { %v434_v52 = vpop.permute.xlu1 %433 }
 0x3b1   :  { %v439_v54 = vsel %vm165_vm2, %v434_v52, 0 }
 0x3b3   :  { %v3302_v46 = vpop.eup %3301 }
 0x3b4   :  { %v280_v47 = vmul.f32 %v3302_v46, %v3298_v39  ;;  %v432_v56 = vpop.permute.xlu1 %431 }
 0x3b6   :  { %v282_v48 = vpack.c.bf16 %v280_v47, %v280_v47 }
 0x3b7   :  { %v3304_v49 = vpop.eup %3303 }
 0x3b8   :  { %v281_v51 = vmul.f32 %v3304_v49, %v3300_v41  ;;  %2981 = vmatmul.mubr.msk.bf16.vlgmr.msra.gmra.mrb[4].mxu1 %vm165_vm2, %v282_v48 }
 0x3b9   :  { %2991 = vmatpush3.bf16.xpose.msra.mxu1 %v389_v50  ;;  %2992 = vmatprep.mubr.msk.bf16.mxu1 %vm3506_vm0, %v3505_v0 }
 0x3ba   :  { %v283_v53 = vpack.c.bf16 %v281_v51, %v281_v51  ;;  %3002 = vmatprep.subr.bf16.mxu1 %v3505_v0 }
 0x3bc   :  { %2987 = vmatmul.mubr.msk.bf16.vlgmr.msra.gmra.mrb[8].mxu0 %vm165_vm2, %v283_v53 }
 0x3bd   :  { %2997 = vmatpush3.bf16.xpose.msra.mxu0 %v439_v54  ;;  %2998 = vmatprep.mubr.msk.bf16.mxu0 %vm3506_vm0, %v3505_v0 }
 0x3be   :  { %3008 = vmatprep.subr.bf16.mxu0 %v3505_v0 }
 0x3c0   :  { %2993 = vmatmul.mubr.msk.bf16.vlgmr.msra.gmra.mrb[8].mxu1 %vm165_vm2, %v382_v55 }
 0x3c1   :  { %3004 = vmatprep.mubr.msk.bf16.mxu1 %vm3506_vm0, %v3505_v0 }
 0x3c4   :  { %2999 = vmatmul.mubr.msk.bf16.vlgmr.msra.gmra.mrb[12].mxu0 %vm165_vm2, %v432_v56 }
 0x3c5   :  { %3010 = vmatprep.mubr.msk.bf16.mxu0 %vm3506_vm0, %v3505_v0 }
 0x48b   :  { %v3699_v57 = vpop.f32.mrb[4].mxu1 }
 0x48c   :  { %v2982_v58 = vpop.f32.mrb[5].mxu1 }
 0x48d   :  { %v330_v59 = vpop.f32.mrb[6].mxu1 }
 0x48e   :  { %v2983_v60 = vpop.f32.mrb[7].mxu1 }
 0x48f   :  { %v3701_v61 = vpop.f32.mrb[8].mxu0 }
 0x490   :  { %v2988_v62 = vpop.f32.mrb[9].mxu0 }
 0x491   :  { %v378_v63 = vpop.f32.mrb[10].mxu0 }
 0x492   :  { %v2989_v1 = vpop.f32.mrb[11].mxu0 }
 0x493   :  { %v425_v2 = vpop.f32.mrb[8].mxu1 }
 0x494   :  { %v2994_v5 = vpop.f32.mrb[9].mxu1  ;;  %v481_v6 = vsel %vm165_vm2, %v425_v2, -inf }
 0x495   :  { %482 = vmax.xlane.f32.xlu1 %v481_v6  ;;  %v428_v7 = vpop.f32.mrb[10].mxu1 }
 0x496   :  { %v2995_v8 = vpop.f32.mrb[11].mxu1 }
 0x497   :  { %v475_v9 = vpop.f32.mrb[12].mxu0 }
 0x498   :  { %v3000_v10 = vpop.f32.mrb[13].mxu0  ;;  %v484_v12 = vsel %vm165_vm2, %v475_v9, -inf }
 0x499   :  { %485 = vmax.xlane.f32.xlu0 %v484_v12  ;;  %v478_v13 = vpop.f32.mrb[14].mxu0 }
 0x49a   :  { %v3001_v15 = vpop.f32.mrb[15].mxu0 }
 0x4a6   :  { %505 = vrot.lane.b32.xlu1 %v3643_v11, %s3510_s21 }
 0x4aa   :  { %603 = vrot.lane.b32.xlu1 %v3643_v11, %s3511_s20 }
 0x4af   :  { %553 = vrot.lane.b32.xlu0 %v3647_v14, %s3510_s21 }
 0x4b3   :  { %601 = vrot.lane.b32.xlu0 %v3643_v11, %s3512_s22 }
 0x522   :  { %v483_v16 = vpop.xlane.xlu1 %482 }
 0x523   :  { %v487_v17 = vsub.f32 %v425_v2, %v483_v16 }
 0x525   :  { %v489_v18 = vmul.f32 1.442695, %v487_v17 }
 0x526   :  { %v506_v19 = vpop.permute.xlu1 %505  ;;  %v486_v20 = vpop.xlane.xlu0 %485 }
 0x527   :  { %3305 = vpow2.f32 %v489_v18  ;;  %v511_v21 = vsel %vm289_vm3, %v506_v19, 0  ;;  %v488_v22 = vsub.f32 %v475_v9, %v486_v20 }
 0x528   :  { %3003 = vmatpush3.bf16.msra.mxu1 %v511_v21 }
 0x529   :  { %v491_v23 = vmul.f32 1.442695, %v488_v22  ;;  %3014 = vmatprep.subr.bf16.mxu1 %v3505_v0 }
 0x52a   :  { %v554_v24 = vpop.permute.xlu0 %553  ;;  %v604_v30 = vpop.permute.xlu1 %603 }
 0x52b   :  { %3307 = vpow2.f32 %v491_v23  ;;  %v559_v25 = vsel %vm289_vm3, %v554_v24, 0  ;;  %v609_v37 = vsel %vm165_vm2, %v604_v30, 0 }
 0x52c   :  { %3009 = vmatpush3.bf16.msra.mxu0 %v559_v25 }
 0x52d   :  { %3020 = vmatprep.subr.bf16.mxu0 %v3505_v0 }
 0x52e   :  { %v602_v42 = vpop.permute.xlu0 %601 }
 0x531   :  { %v3306_v26 = vpop.eup %3305 }
 0x532   :  { %v493_v27 = vsel %vm165_vm2, %v3306_v26, 0.0 }
 0x533   :  { %494 = vadd.xlane.f32.xlu1 %v493_v27 }
 0x535   :  { %v3308_v28 = vpop.eup %3307 }
 0x536   :  { %v496_v29 = vsel %vm165_vm2, %v3308_v28, 0.0 }
 0x537   :  { %497 = vadd.xlane.f32.xlu1 %v496_v29 }
 0x548   :  { %653 = vrot.lane.b32.xlu1 %v3647_v14, %s3511_s20 }
 0x54c   :  { %651 = vrot.lane.b32.xlu1 %v3647_v14, %s3512_s22 }
 0x5c0   :  { %v495_v31 = vpop.xlane.xlu1 %494 }
 0x5c1   :  { %3309 = vrcp.f32 %v495_v31 }
 0x5c4   :  { %v498_v32 = vpop.xlane.xlu1 %497 }
 0x5c5   :  { %3311 = vrcp.f32 %v498_v32 }
 0x5c8   :  { %v654_v39 = vpop.permute.xlu1 %653 }
 0x5c9   :  { %v659_v41 = vsel %vm165_vm2, %v654_v39, 0 }
 0x5cb   :  { %v3310_v33 = vpop.eup %3309 }
 0x5cc   :  { %v501_v34 = vmul.f32 %v3310_v33, %v3306_v26  ;;  %v652_v43 = vpop.permute.xlu1 %651 }
 0x5ce   :  { %v503_v35 = vpack.c.bf16 %v501_v34, %v501_v34 }
 0x5cf   :  { %v3312_v36 = vpop.eup %3311 }
 0x5d0   :  { %v502_v38 = vmul.f32 %v3312_v36, %v3308_v28  ;;  %3005 = vmatmul.mubr.msk.bf16.vlgmr.msra.gmra.mrb[12].mxu1 %vm165_vm2, %v503_v35 }
 0x5d1   :  { %3015 = vmatpush3.bf16.xpose.msra.mxu1 %v609_v37  ;;  %3016 = vmatprep.mubr.msk.bf16.mxu1 %vm3506_vm0, %v3505_v0 }
 0x5d2   :  { %v504_v40 = vpack.c.bf16 %v502_v38, %v502_v38  ;;  %3026 = vmatprep.subr.bf16.mxu1 %v3505_v0 }
 0x5d4   :  { %3011 = vmatmul.mubr.msk.bf16.vlgmr.msra.gmra.mrb[16].mxu0 %vm165_vm2, %v504_v40 }
 0x5d5   :  { %3021 = vmatpush3.bf16.xpose.msra.mxu0 %v659_v41  ;;  %3022 = vmatprep.mubr.msk.bf16.mxu0 %vm3506_vm0, %v3505_v0 }
 0x5d6   :  { %3032 = vmatprep.subr.bf16.mxu0 %v3505_v0 }
 0x5d8   :  { %3017 = vmatmul.mubr.msk.bf16.vlgmr.msra.gmra.mrb[16].mxu1 %vm165_vm2, %v602_v42 }
 0x5d9   :  { %3028 = vmatprep.mubr.msk.bf16.mxu1 %vm3506_vm0, %v3505_v0 }
 0x5dc   :  { %3023 = vmatmul.mubr.msk.bf16.vlgmr.msra.gmra.mrb[20].mxu0 %vm165_vm2, %v652_v43 }
 0x5dd   :  { %3034 = vmatprep.mubr.msk.bf16.mxu0 %vm3506_vm0, %v3505_v0 }
 0x6a3   :  { %v3739_v44 = vpop.f32.mrb[12].mxu1 }
 0x6a4   :  { %v3006_v45 = vpop.f32.mrb[13].mxu1 }
 0x6a5   :  { %v550_v46 = vpop.f32.mrb[14].mxu1 }
 0x6a6   :  { %v3007_v47 = vpop.f32.mrb[15].mxu1 }
 0x6a7   :  { %v3741_v48 = vpop.f32.mrb[16].mxu0 }
 0x6a8   :  { %v3247_v49 = vpack.i.bf16 %v3741_v48, %v3739_v44  ;;  %v3012_v50 = vpop.f32.mrb[17].mxu0 }
 0x6a9   :  { %v598_v51 = vpop.f32.mrb[18].mxu0 }
 0x6aa   :  { %v3013_v52 = vpop.f32.mrb[19].mxu0 }
 0x6ab   :  { %v645_v53 = vpop.f32.mrb[16].mxu1 }
 0x6ac   :  { %v3018_v54 = vpop.f32.mrb[17].mxu1  ;;  %v701_v55 = vsel %vm165_vm2, %v645_v53, -inf }
 0x6ad   :  { %702 = vmax.xlane.f32.xlu0 %v701_v55  ;;  %v648_v56 = vpop.f32.mrb[18].mxu1 }
 0x6ae   :  { %v3019_v58 = vpop.f32.mrb[19].mxu1 }
 0x6af   :  { %v695_v59 = vpop.f32.mrb[20].mxu0 }
 0x6b0   :  { %v3024_v60 = vpop.f32.mrb[21].mxu0  ;;  %v704_v62 = vsel %vm165_vm2, %v695_v59, -inf }
 0x6b1   :  { %705 = vmax.xlane.f32.xlu1 %v704_v62  ;;  %v698_v63 = vpop.f32.mrb[22].mxu0 }
 0x6b2   :  { %v3025_v1 = vpop.f32.mrb[23].mxu0 }
 0x6c2   :  { %725 = vrot.lane.b32.xlu1 %v3643_v11, %s3513_s23 }
 0x6c6   :  { %823 = vrot.lane.b32.xlu1 %v3643_v11, %s3514_s24 }
 0x6ca   :  { %873 = vrot.lane.b32.xlu1 %v3647_v14, %s3514_s24 }
 0x6ce   :  { %871 = vrot.lane.b32.xlu1 %v3647_v14, %s3515_s25 }
 0x73a   :  { %v703_v2 = vpop.xlane.xlu0 %702 }
 0x73b   :  { %v707_v5 = vsub.f32 %v645_v53, %v703_v2 }
 0x73d   :  { %v709_v6 = vmul.f32 1.442695, %v707_v5 }
 0x73e   :  { %v706_v7 = vpop.xlane.xlu1 %705 }
 0x73f   :  { %3313 = vpow2.f32 %v709_v6  ;;  %v708_v8 = vsub.f32 %v695_v59, %v706_v7 }
 0x741   :  { %v711_v9 = vmul.f32 1.442695, %v708_v8 }
 0x742   :  { %v726_v10 = vpop.permute.xlu1 %725 }
 0x743   :  { %3315 = vpow2.f32 %v711_v9  ;;  %v731_v12 = vsel %vm289_vm3, %v726_v10, 0 }
 0x744   :  { %3027 = vmatpush3.bf16.msra.mxu1 %v731_v12 }
 0x745   :  { %3038 = vmatprep.subr.bf16.mxu1 %v3505_v0 }
 0x746   :  { %v824_v23 = vpop.permute.xlu1 %823 }
 0x747   :  { %v829_v27 = vsel %vm165_vm2, %v824_v23, 0 }
 0x749   :  { %v3314_v13 = vpop.eup %3313 }
 0x74a   :  { %v713_v15 = vsel %vm165_vm2, %v3314_v13, 0.0  ;;  %v874_v29 = vpop.permute.xlu1 %873 }
 0x74b   :  { %714 = vadd.xlane.f32.xlu0 %v713_v15  ;;  %v879_v31 = vsel %vm165_vm2, %v874_v29, 0 }
 0x74d   :  { %v3316_v16 = vpop.eup %3315 }
 0x74e   :  { %v716_v17 = vsel %vm165_vm2, %v3316_v16, 0.0  ;;  %v872_v33 = vpop.permute.xlu1 %871 }
 0x74f   :  { %717 = vadd.xlane.f32.xlu0 %v716_v17  ;;  %v3282_v17 = vld [vmem:[#allocation7 + $0x8] sm:$0xff]  }
 0x765   :  { %773 = vrot.lane.b32.xlu0 %v3647_v14, %s3513_s23 }
 0x769   :  { %821 = vrot.lane.b32.xlu0 %v3643_v11, %s3515_s25 }
 0x7d8   :  { %v715_v18 = vpop.xlane.xlu0 %714 }
 0x7d9   :  { %3317 = vrcp.f32 %v715_v18 }
 0x7dc   :  { %v718_v19 = vpop.xlane.xlu0 %717 }
 0x7dd   :  { %3319 = vrcp.f32 %v718_v19 }
 0x7e0   :  { %v774_v20 = vpop.permute.xlu0 %773 }
 0x7e1   :  { %v779_v21 = vsel %vm289_vm3, %v774_v20, 0 }
 0x7e2   :  { %3033 = vmatpush3.bf16.msra.mxu0 %v779_v21 }
 0x7e3   :  { %v3318_v22 = vpop.eup %3317  ;;  %3044 = vmatprep.subr.bf16.mxu0 %v3505_v0 }
 0x7e4   :  { %v721_v24 = vmul.f32 %v3318_v22, %v3314_v13  ;;  %v822_v32 = vpop.permute.xlu0 %821 }
 0x7e6   :  { %v723_v25 = vpack.c.bf16 %v721_v24, %v721_v24 }
 0x7e7   :  { %v3320_v26 = vpop.eup %3319 }
 0x7e8   :  { %v722_v28 = vmul.f32 %v3320_v26, %v3316_v16  ;;  %3029 = vmatmul.mubr.msk.bf16.vlgmr.msra.gmra.mrb[20].mxu1 %vm165_vm2, %v723_v25  ;;  %v3281_v16 = vld [vmem:[#allocation7] sm:$0xff]  }
 0x7e9   :  { %3039 = vmatpush3.bf16.xpose.msra.mxu1 %v829_v27  ;;  %3040 = vmatprep.mubr.msk.bf16.mxu1 %vm3506_vm0, %v3505_v0 }
 0x7ea   :  { %v724_v30 = vpack.c.bf16 %v722_v28, %v722_v28  ;;  %3050 = vmatprep.subr.bf16.mxu1 %v3505_v0 }
 0x7ec   :  { %3035 = vmatmul.mubr.msk.bf16.vlgmr.msra.gmra.mrb[24].mxu0 %vm165_vm2, %v724_v30 }
 0x7ed   :  { %3045 = vmatpush3.bf16.xpose.msra.mxu0 %v879_v31  ;;  %3046 = vmatprep.mubr.msk.bf16.mxu0 %vm3506_vm0, %v3505_v0 }
 0x7ee   :  { %3056 = vmatprep.subr.bf16.mxu0 %v3505_v0 }
 0x7f0   :  { %3041 = vmatmul.mubr.msk.bf16.vlgmr.msra.gmra.mrb[24].mxu1 %vm165_vm2, %v822_v32 }
 0x7f1   :  { %3052 = vmatprep.mubr.msk.bf16.mxu1 %vm3506_vm0, %v3505_v0 }
 0x7f4   :  { %3047 = vmatmul.mubr.msk.bf16.vlgmr.msra.gmra.mrb[28].mxu0 %vm165_vm2, %v872_v33 }
 0x7f5   :  { %3058 = vmatprep.mubr.msk.bf16.mxu0 %vm3506_vm0, %v3505_v0 }
 0x8bb   :  { %v767_v34 = vpop.f32.mrb[20].mxu1 }
 0x8bc   :  { %v3030_v35 = vpop.f32.mrb[21].mxu1 }
 0x8bd   :  { %v770_v36 = vpop.f32.mrb[22].mxu1 }
 0x8be   :  { %v3031_v37 = vpop.f32.mrb[23].mxu1 }
 0x8bf   :  { %v815_v38 = vpop.f32.mrb[24].mxu0 }
 0x8c0   :  { %v3252_v39 = vpack.i.bf16 %v815_v38, %v767_v34  ;;  %v3036_v40 = vpop.f32.mrb[25].mxu0 }
 0x8c1   :  { %v818_v41 = vpop.f32.mrb[26].mxu0 }
 0x8c2   :  { %v3037_v42 = vpop.f32.mrb[27].mxu0 }
 0x8c3   :  { %v865_v43 = vpop.f32.mrb[24].mxu1 }
 0x8c4   :  { %v3042_v45 = vpop.f32.mrb[25].mxu1  ;;  %v921_v46 = vsel %vm165_vm2, %v865_v43, -inf }
 0x8c5   :  { %922 = vmax.xlane.f32.xlu0 %v921_v46  ;;  %v868_v47 = vpop.f32.mrb[26].mxu1 }
 0x8c6   :  { %v3043_v50 = vpop.f32.mrb[27].mxu1 }
 0x8c7   :  { %v915_v51 = vpop.f32.mrb[28].mxu0 }
 0x8c8   :  { %v3048_v52 = vpop.f32.mrb[29].mxu0  ;;  %v924_v53 = vsel %vm165_vm2, %v915_v51, -inf }
 0x8c9   :  { %925 = vmax.xlane.f32.xlu1 %v924_v53  ;;  %v918_v54 = vpop.f32.mrb[30].mxu0 }
 0x8ca   :  { %v3049_v55 = vpop.f32.mrb[31].mxu0 }
 0x8da   :  { %945 = vrot.lane.b32.xlu1 %v3643_v11, %s3516_s26 }
 0x8de   :  { %3248 = vrot.lane.b32.xlu1 %v3247_v49, %s3500_s28 }
 0x8e2   :  { %3253 = vrot.lane.b32.xlu1 %v3252_v39, %s3496_s15 }
 0x952   :  { %v923_v56 = vpop.xlane.xlu0 %922 }
 0x953   :  { %v927_v58 = vsub.f32 %v865_v43, %v923_v56 }
 0x955   :  { %v929_v59 = vmul.f32 1.442695, %v927_v58 }
 0x956   :  { %v926_v60 = vpop.xlane.xlu1 %925 }
 0x957   :  { %3321 = vpow2.f32 %v929_v59  ;;  %v928_v62 = vsub.f32 %v915_v51, %v926_v60 }
 0x959   :  { %v931_v63 = vmul.f32 1.442695, %v928_v62 }
 0x95a   :  { %v946_v1 = vpop.permute.xlu1 %945 }
 0x95b   :  { %3323 = vpow2.f32 %v931_v63  ;;  %v951_v2 = vsel %vm289_vm3, %v946_v1, 0 }
 0x95c   :  { %3051 = vmatpush3.bf16.msra.mxu1 %v951_v2 }
 0x95d   :  { %3062 = vmatprep.subr.bf16.mxu1 %v3505_v0 }
 0x95e   :  { %v3249_v27 = vpop.permute.xlu1 %3248 }
 0x95f   :  { %v3251_v29 = vunpack.i.h.bf16 %v3249_v27  ;;  %v3250_v30 = vunpack.i.l.bf16 %v3249_v27 }
 0x961   :  { %v3322_v11 = vpop.eup %3321  ;;  %v1066_v34 = vsel %vm165_vm2, %v3701_v61, %v3251_v29  ;;  %v1065_v35 = vsel %vm165_vm2, %v3699_v57, %v3250_v30  ;;  %v2793_v57 = vld [vmem:[%s4125_s5] ss:$0 sm:$0xff] }
 0x962   :  { %v933_v44 = vsel %vm165_vm2, %v3322_v11, 0.0  ;;  %v3254_v28 = vpop.permute.xlu1 %3253 }
 0x963   :  { %934 = vadd.xlane.f32.xlu0 %v933_v44  ;;  %v3256_v31 = vunpack.i.h.bf16 %v3254_v28  ;;  %v3255_v32 = vunpack.i.l.bf16 %v3254_v28 }
 0x965   :  { %v3324_v48 = vpop.eup %3323  ;;  %v1068_v38 = vsel %vm1067_vm4, %v1065_v35, %v3255_v32  ;;  %v1069_v39 = vsel %vm1067_vm4, %v1066_v34, %v3256_v31  ;;  %v2803_v32 = vld [vmem:[%s4125_s5 + $0x4] ss:$0 sm:$0xff] }
 0x966   :  { %v936_v49 = vsel %vm165_vm2, %v3324_v48, 0.0 }
 0x967   :  { %937 = vadd.xlane.f32.xlu0 %v936_v49 }
 0x97d   :  { %993 = vrot.lane.b32.xlu0 %v3647_v14, %s3516_s26 }
 0x9f0   :  { %v935_v5 = vpop.xlane.xlu0 %934 }
 0x9f1   :  { %3325 = vrcp.f32 %v935_v5 }
 0x9f4   :  { %v938_v6 = vpop.xlane.xlu0 %937 }
 0x9f5   :  { %3327 = vrcp.f32 %v938_v6 }
 0x9f8   :  { %v994_v7 = vpop.permute.xlu0 %993 }
 0x9f9   :  { %v999_v8 = vsel %vm289_vm3, %v994_v7, 0 }
 0x9fa   :  { %3057 = vmatpush3.bf16.msra.mxu0 %v999_v8 }
 0x9fb   :  { %v3326_v9 = vpop.eup %3325  ;;  %3070 = vmatprep.subr.bf16.mxu0 %v3505_v0 }
 0x9fc   :  { %v941_v10 = vmul.f32 %v3326_v9, %v3322_v11  ;;  %v3283_v11 = vld [vmem:[#allocation8] sm:$0xff]   ;;  %v2797_v9 = vld [vmem:[%s4125_s5 + $0x1] ss:$0 sm:$0xff] }
 0x9fe   :  { %v943_v12 = vpack.c.bf16 %v941_v10, %v941_v10 }
 0x9ff   :  { %v3328_v13 = vpop.eup %3327 }
 0xa00   :  { %v942_v15 = vmul.f32 %v3328_v13, %v3324_v48  ;;  %3053 = vmatmul.mubr.msk.bf16.vlgmr.msra.gmra.mrb[28].mxu1 %vm165_vm2, %v943_v12 }
 0xa01   :  { %3066 = vmatprep.mubr.msk.bf16.mxu1 %vm3506_vm0, %v3505_v0  ;;  %3063 = vmatpush3.bf16.msra.mxu1 %v3281_v16 }
 0xa02   :  { %v944_v14 = vpack.c.bf16 %v942_v15, %v942_v15  ;;  %3064 = vmatprep.subr.bf16.mxu1 %v3505_v0 }
 0xa04   :  { %3059 = vmatmul.mubr.msk.bf16.vlgmr.msra.gmra.mrb[32].mxu0 %vm165_vm2, %v944_v14  ;;  %v2798_v14 = vld [vmem:[%s4125_s5 + $0x2] ss:$0 sm:$0xff] }
 0xa05   :  { %3074 = vmatprep.mubr.msk.bf16.mxu0 %vm3506_vm0, %v3505_v0  ;;  %3065 = vmatpush3.bf16.msra.mxu1 %v3282_v17 }
 0xa06   :  { %3078 = vmatprep.subr.bf16.mxu1 %v3505_v0  ;;  %3071 = vmatpush3.bf16.msra.mxu0 %v3283_v11 }
 0xa07   :  { %3072 = vmatprep.subr.bf16.mxu0 %v3505_v0 }
 0xad3   :  { %v987_v18 = vpop.f32.mrb[28].mxu1 }
 0xad4   :  { %v3054_v19 = vpop.f32.mrb[29].mxu1 }
 0xad5   :  { %v990_v20 = vpop.f32.mrb[30].mxu1 }
 0xad6   :  { %v3055_v21 = vpop.f32.mrb[31].mxu1  ;;  %v3285_v20 = vld [vmem:[#allocation8 + $0x10] sm:$0xff]  }
 0xad7   :  { %v1035_v22 = vpop.f32.mrb[32].mxu0  ;;  %v3286_v21 = vld [vmem:[#allocation8 + $0x18] sm:$0xff]  }
 0xad8   :  { %v3257_v23 = vpack.i.bf16 %v1035_v22, %v987_v18  ;;  %v3060_v24 = vpop.f32.mrb[33].mxu0  ;;  %v2799_v22 = vld [vmem:[%s4125_s5 + $0x3] ss:$0 sm:$0xff] }
 0xad9   :  { %v1038_v25 = vpop.f32.mrb[34].mxu0 }
 0xada   :  { %3258 = vrot.lane.b32.xlu0 %v3257_v23, %s3517_s27  ;;  %v3061_v26 = vpop.f32.mrb[35].mxu0 }
 0xb4c   :  { %v3259_v33 = vpop.permute.xlu0 %3258 }
 0xb4d   :  { %v3261_v36 = vunpack.i.h.bf16 %v3259_v33  ;;  %v3260_v37 = vunpack.i.l.bf16 %v3259_v33 }
 0xb4f   :  { %v1072_v40 = vsel %vm1070_vm5, %v1069_v39, %v3261_v36  ;;  %v1071_v41 = vsel %vm1070_vm5, %v1068_v38, %v3260_v37 }
 0xb50   :  { %v1073_v42 = vpack.c.bf16 %v1072_v40, %v1071_v41 }
 0xb52   :  { %3067 = vmatmul.mubr.msk.bf16.vlgmr.msra.gmra.mrb[32].mxu1 %vm112_vm1, %v1073_v42 }
 0xb53   :  { %3082 = vmatprep.mubr.msk.bf16.mxu1 %vm3506_vm0, %v3505_v0  ;;  %3079 = vmatpush3.bf16.msra.mxu1 %v3285_v20 }
 0xb54   :  { %3080 = vmatprep.subr.bf16.mxu1 %v3505_v0 }
 0xb57   :  { %3081 = vmatpush3.bf16.msra.mxu1 %v3286_v21 }
 0xb58   :  { %3094 = vmatprep.subr.bf16.mxu1 %v3505_v0 }
 0xc25   :  { %v1132_v61 = vpop.f32.mrb[32].mxu1 }
 0xc26   :  { %v1133_v43 = vadd.f32 %v2793_v57, %v1132_v61  ;;  %v3068_v45 = vpop.f32.mrb[33].mxu1 }
 0xc27   :  { %v1135_v46 = vpop.f32.mrb[34].mxu1 }
 0xc28   :  { %v1136_v47 = vadd.f32 %v2793_v57, %v1135_v46  ;;  %v3069_v50 = vpop.f32.mrb[35].mxu1  ;;  %v1139_v51 = vadd.f32 %v1133_v43, %v3632_v3 }
 0xc2a   :  { %v1143_v52 = vsel %vm112_vm1, %v1139_v51, 0.0  ;;  %v1140_v53 = vadd.f32 %v1136_v47, %v3634_v4  ;;  %v3284_v4 = vld [vmem:[#allocation8 + $0x8] sm:$0xff]  }
 0xc2b   :  { %1144 = vadd.xlane.f32.xlu1 %v1143_v52  ;;  %3073 = vmatpush3.bf16.msra.mxu0 %v3284_v4 }
 0xc2c   :  { %v1146_v54 = vsel %vm112_vm1, %v1140_v53, 0.0  ;;  %3086 = vmatprep.subr.bf16.mxu0 %v3505_v0 }
 0xc2d   :  { %1147 = vadd.xlane.f32.xlu0 %v1146_v54  ;;  %v3287_v54 = vld [vmem:[%s4121_s1 + $0x10] sm:$0xff]  }
 0xcb8   :  { %v1145_v55 = vpop.xlane.xlu1 %1144 }
 0xcb9   :  { %v1150_v56 = vmul.f32 0.03125, %v1145_v55  ;;  %v3288_v55 = vld [vmem:[%s4121_s1 + $0x18] sm:$0xff]  }
 0xcba   :  { %v1148_v58 = vpop.xlane.xlu0 %1147 }
 0xcbb   :  { %v1152_v59 = vsub.f32 %v1139_v51, %v1150_v56  ;;  %v1151_v60 = vmul.f32 0.03125, %v1148_v58 }
 0xcbd   :  { %v1153_v62 = vsub.f32 %v1140_v53, %v1151_v60  ;;  %v1154_v63 = vmul.f32 %v1152_v59, %v1152_v59 }
 0xcbf   :  { %v1156_v1 = vsel %vm112_vm1, %v1154_v63, 0.0  ;;  %v1155_v2 = vmul.f32 %v1153_v62, %v1153_v62 }
 0xcc0   :  { %1157 = vadd.xlane.f32.xlu0 %v1156_v1 }
 0xcc1   :  { %v1159_v3 = vsel %vm112_vm1, %v1155_v2, 0.0  ;;  %v2807_v2 = vld [vmem:[%s4125_s5 + $0x5] ss:$0 sm:$0xff] }
 0xcc2   :  { %1160 = vadd.xlane.f32.xlu1 %v1159_v3 }
 0xd4d   :  { %v1158_v44 = vpop.xlane.xlu0 %1157 }
 0xd4e   :  { %v1162_v48 = vmul.f32 0.03125, %v1158_v44 }
 0xd4f   :  { %v1161_v49 = vpop.xlane.xlu1 %1160 }
 0xd50   :  { %v1164_v5 = vadd.f32 1e-05, %v1162_v48  ;;  %v1163_v6 = vmul.f32 0.03125, %v1161_v49  ;;  %v2808_v48 = vld [vmem:[%s4125_s5 + $0x6] ss:$0 sm:$0xff] }
 0xd52   :  { %3329 = vrsqrt.f32 %v1164_v5  ;;  %v1165_v7 = vadd.f32 1e-05, %v1163_v6 }
 0xd54   :  { %3331 = vrsqrt.f32 %v1165_v7 }
 0xd5c   :  { %v3330_v8 = vpop.eup %3329 }
 0xd5d   :  { %v1168_v10 = vmul.f32 %v3330_v8, %v1152_v59  ;;  %v2813_v8 = vld [vmem:[#allocation5 + $0x1] ss:$0 sm:$0xff] }
 0xd5e   :  { %v3332_v12 = vpop.eup %3331 }
 0xd5f   :  { %v1174_v13 = vmul.f32 %v2797_v9, %v1168_v10  ;;  %v1169_v15 = vmul.f32 %v3332_v12, %v1153_v62 }
 0xd61   :  { %v1175_v16 = vmul.f32 %v2797_v9, %v1169_v15  ;;  %v1180_v17 = vadd.f32 %v2798_v14, %v1174_v13 }
 0xd63   :  { %v1181_v18 = vadd.f32 %v2798_v14, %v1175_v16 }
 0xd65   :  { %v1182_v19 = vpack.c.bf16 %v1181_v18, %v1180_v17 }
 0xd67   :  { %3075 = vmatmul.mubr.msk.bf16.vlgmr.msra.gmra.mrb[36].mxu0 %vm112_vm1, %v1182_v19 }
 0xd68   :  { %3090 = vmatprep.mubr.msk.bf16.mxu0 %vm3506_vm0, %v3505_v0  ;;  %3087 = vmatpush3.bf16.msra.mxu0 %v3287_v54 }
 0xd69   :  { %3088 = vmatprep.subr.bf16.mxu0 %v3505_v0 }
 0xd6c   :  { %3089 = vmatpush3.bf16.msra.mxu0 %v3288_v55 }
 0xd6d   :  { %3100 = vmatprep.subr.bf16.mxu0 %v3505_v0 }
 0xe3a   :  { %v1241_v23 = vpop.f32.mrb[36].mxu0 }
 0xe3b   :  { %v1242_v24 = vadd.f32 %v2799_v22, %v1241_v23  ;;  %v3076_v25 = vpop.f32.mrb[37].mxu0 }
 0xe3c   :  { %v1244_v26 = vpop.f32.mrb[38].mxu0 }
 0xe3d   :  { %v1245_v27 = vadd.f32 %v2799_v22, %v1244_v26  ;;  %v3077_v28 = vpop.f32.mrb[39].mxu0  ;;  %v1248_v29 = vmax.f32 %v1242_v24, 0.0 }
 0xe3f   :  { %v1249_v30 = vmax.f32 %v1245_v27, 0.0 }
 0xe41   :  { %v1250_v31 = vpack.c.bf16 %v1249_v30, %v1248_v29 }
 0xe43   :  { %3083 = vmatmul.mubr.msk.bf16.vlgmr.msra.gmra.mrb[36].mxu1 %vm112_vm1, %v1250_v31 }
 0xe44   :  { %3096 = vmatprep.mubr.msk.bf16.mxu1 %vm3506_vm0, %v3505_v0 }
 0xf16   :  { %v1310_v33 = vpop.f32.mrb[36].mxu1 }
 0xf17   :  { %v1311_v34 = vadd.f32 %v2803_v32, %v1310_v33  ;;  %v3084_v35 = vpop.f32.mrb[37].mxu1 }
 0xf18   :  { %v1313_v36 = vpop.f32.mrb[38].mxu1 }
 0xf19   :  { %v1314_v37 = vadd.f32 %v2803_v32, %v1313_v36  ;;  %v3085_v38 = vpop.f32.mrb[39].mxu1  ;;  %v1317_v39 = vadd.f32 %v1311_v34, %v1180_v17 }
 0xf1b   :  { %v1321_v40 = vsel %vm112_vm1, %v1317_v39, 0.0  ;;  %v1318_v41 = vadd.f32 %v1314_v37, %v1181_v18 }
 0xf1c   :  { %1322 = vadd.xlane.f32.xlu0 %v1321_v40 }
 0xf1d   :  { %v1324_v42 = vsel %vm112_vm1, %v1318_v41, 0.0 }
 0xf1e   :  { %1325 = vadd.xlane.f32.xlu1 %v1324_v42 }
 0xfa9   :  { %v1323_v57 = vpop.xlane.xlu0 %1322 }
 0xfaa   :  { %v1327_v61 = vmul.f32 0.03125, %v1323_v57 }
 0xfab   :  { %v1326_v43 = vpop.xlane.xlu1 %1325 }
 0xfac   :  { %v1329_v45 = vsub.f32 %v1317_v39, %v1327_v61  ;;  %v1328_v46 = vmul.f32 0.03125, %v1326_v43 }
 0xfae   :  { %v1330_v47 = vsub.f32 %v1318_v41, %v1328_v46  ;;  %v1331_v50 = vmul.f32 %v1329_v45, %v1329_v45 }
 0xfb0   :  { %v1333_v51 = vsel %vm112_vm1, %v1331_v50, 0.0  ;;  %v1332_v52 = vmul.f32 %v1330_v47, %v1330_v47 }
 0xfb1   :  { %1334 = vadd.xlane.f32.xlu0 %v1333_v51 }
 0xfb2   :  { %v1336_v53 = vsel %vm112_vm1, %v1332_v52, 0.0 }
 0xfb3   :  { %1337 = vadd.xlane.f32.xlu1 %v1336_v53 }
0x103e   :  { %v1335_v56 = vpop.xlane.xlu0 %1334 }
0x103f   :  { %v1339_v58 = vmul.f32 0.03125, %v1335_v56 }
0x1040   :  { %v1338_v59 = vpop.xlane.xlu1 %1337 }
0x1041   :  { %v1341_v60 = vadd.f32 1e-05, %v1339_v58  ;;  %v1340_v62 = vmul.f32 0.03125, %v1338_v59 }
0x1043   :  { %3333 = vrsqrt.f32 %v1341_v60  ;;  %v1342_v63 = vadd.f32 1e-05, %v1340_v62 }
0x1045   :  { %3335 = vrsqrt.f32 %v1342_v63 }
0x104d   :  { %v3334_v1 = vpop.eup %3333 }
0x104e   :  { %v1345_v3 = vmul.f32 %v3334_v1, %v1329_v45 }
0x104f   :  { %v3336_v11 = vpop.eup %3335 }
0x1050   :  { %v1351_v4 = vmul.f32 %v2807_v2, %v1345_v3  ;;  %v1346_v44 = vmul.f32 %v3336_v11, %v1330_v47 }
0x1052   :  { %v1352_v49 = vmul.f32 %v2807_v2, %v1346_v44  ;;  %v3867_v5 = vadd.f32 %v2808_v48, %v1351_v4 }
0x1054   :  { %v3869_v6 = vadd.f32 %v2808_v48, %v1352_v49 }
0x1056   :  { %v1359_v7 = vpack.c.bf16 %v3869_v6, %v3867_v5 }
0x1058   :  { %3091 = vmatmul.mubr.msk.bf16.vlgmr.msra.gmra.mrb[40].mxu0 %vm112_vm1, %v1359_v7 }
0x1059   :  { %3102 = vmatprep.mubr.msk.bf16.mxu0 %vm3506_vm0, %v3505_v0 }
0x112b   :  { %v1422_v9 = vpop.f32.mrb[40].mxu0 }
0x112c   :  { %v1423_v10 = vadd.f32 %v2813_v8, %v1422_v9  ;;  %v3092_v12 = vpop.f32.mrb[41].mxu0 }
0x112d   :  { %v1425_v13 = vpop.f32.mrb[42].mxu0 }
0x112e   :  { %v3876_v15 = vpack.c.bf16 %v1423_v10, %v1423_v10  ;;  %v1426_v14 = vadd.f32 %v2813_v8, %v1425_v13  ;;  %v3093_v16 = vpop.f32.mrb[43].mxu0 }
0x1130   :  { %v3878_v17 = vpack.c.bf16 %v1426_v14, %v1426_v14  ;;  %1435 = vrot.lane.b32.xlu0 %v3876_v15, %s3507_s17 }
0x1132   :  { %1483 = vrot.lane.b32.xlu1 %v3878_v17, %s3507_s17 }
0x11a2   :  { %v1436_v18 = vpop.permute.xlu0 %1435 }
0x11a3   :  { %v1441_v19 = vsel %vm165_vm2, %v1436_v18, 0 }
0x11a4   :  { %3095 = vmatpush3.bf16.xpose.msra.mxu1 %v1441_v19  ;;  %v1484_v20 = vpop.permute.xlu1 %1483 }
0x11a5   :  { %v1489_v21 = vsel %vm165_vm2, %v1484_v20, 0  ;;  %3106 = vmatprep.subr.bf16.mxu1 %v3505_v0 }
0x11a6   :  { %3101 = vmatpush3.bf16.xpose.msra.mxu0 %v1489_v21 }
0x11a7   :  { %3112 = vmatprep.subr.bf16.mxu0 %v3505_v0 }
0x11ab   :  { %3097 = vmatmul.mubr.msk.bf16.vlgmr.msra.gmra.mrb[40].mxu1 %vm165_vm2, %v3876_v15 }
0x11ac   :  { %3108 = vmatprep.mubr.msk.bf16.mxu1 %vm3506_vm0, %v3505_v0 }
0x11ad   :  { %3103 = vmatmul.mubr.msk.bf16.vlgmr.msra.gmra.mrb[44].mxu0 %vm165_vm2, %v3878_v17 }
0x11ae   :  { %3114 = vmatprep.mubr.msk.bf16.mxu0 %vm3506_vm0, %v3505_v0 }
0x127e   :  { %v1477_v22 = vpop.f32.mrb[40].mxu1 }
0x127f   :  { %v3098_v23 = vpop.f32.mrb[41].mxu1  ;;  %v1531_v24 = vsel %vm165_vm2, %v1477_v22, -inf }
0x1280   :  { %v1480_v25 = vpop.f32.mrb[42].mxu1  ;;  %1532 = vmax.xlane.f32.xlu1 %v1531_v24  ;;  %v1525_v26 = vpop.f32.mrb[44].mxu0 }
0x1281   :  { %v3099_v27 = vpop.f32.mrb[43].mxu1  ;;  %v3104_v28 = vpop.f32.mrb[45].mxu0  ;;  %v1534_v29 = vsel %vm165_vm2, %v1525_v26, -inf }
0x1282   :  { %1535 = vmax.xlane.f32.xlu0 %v1534_v29  ;;  %v1528_v30 = vpop.f32.mrb[46].mxu0 }
0x1283   :  { %v3105_v31 = vpop.f32.mrb[47].mxu0 }
0x1291   :  { %1603 = vrot.lane.b32.xlu1 %v3878_v17, %s3502_s0 }
0x1298   :  { %1555 = vrot.lane.b32.xlu0 %v3876_v15, %s3502_s0 }
0x130d   :  { %v1533_v32 = vpop.xlane.xlu1 %1532 }
0x130e   :  { %v1537_v33 = vsub.f32 %v1477_v22, %v1533_v32 }
0x130f   :  { %v1536_v34 = vpop.xlane.xlu0 %1535 }
0x1310   :  { %v1539_v35 = vmul.f32 1.442695, %v1537_v33  ;;  %v1538_v36 = vsub.f32 %v1525_v26, %v1536_v34 }
0x1311   :  { %v1604_v37 = vpop.permute.xlu1 %1603 }
0x1312   :  { %3337 = vpow2.f32 %v1539_v35  ;;  %v1541_v38 = vmul.f32 1.442695, %v1538_v36  ;;  %v1609_v39 = vsel %vm289_vm3, %v1604_v37, 0 }
0x1313   :  { %3113 = vmatpush3.bf16.msra.mxu0 %v1609_v39  ;;  %v1556_v40 = vpop.permute.xlu0 %1555 }
0x1314   :  { %3339 = vpow2.f32 %v1541_v38  ;;  %v1561_v41 = vsel %vm289_vm3, %v1556_v40, 0  ;;  %3124 = vmatprep.subr.bf16.mxu0 %v3505_v0 }
0x1315   :  { %3107 = vmatpush3.bf16.msra.mxu1 %v1561_v41 }
0x1316   :  { %3118 = vmatprep.subr.bf16.mxu1 %v3505_v0 }
0x131c   :  { %v3338_v42 = vpop.eup %3337 }
0x131d   :  { %v1543_v57 = vsel %vm165_vm2, %v3338_v42, 0.0 }
0x131e   :  { %v3340_v61 = vpop.eup %3339  ;;  %1544 = vadd.xlane.f32.xlu0 %v1543_v57 }
0x131f   :  { %v1546_v43 = vsel %vm165_vm2, %v3340_v61, 0.0 }
0x1320   :  { %1547 = vadd.xlane.f32.xlu1 %v1546_v43 }
0x1331   :  { %1653 = vrot.lane.b32.xlu1 %v3876_v15, %s3508_s18 }
0x1334   :  { %1703 = vrot.lane.b32.xlu0 %v3878_v17, %s3508_s18 }
0x1335   :  { %1651 = vrot.lane.b32.xlu1 %v3876_v15, %s3509_s19 }
0x1338   :  { %1701 = vrot.lane.b32.xlu0 %v3878_v17, %s3509_s19 }
0x13ab   :  { %v1545_v45 = vpop.xlane.xlu0 %1544 }
0x13ac   :  { %3341 = vrcp.f32 %v1545_v45 }
0x13ad   :  { %v1548_v46 = vpop.xlane.xlu1 %1547 }
0x13ae   :  { %3343 = vrcp.f32 %v1548_v46 }
0x13af   :  { %v1704_v55 = vpop.permute.xlu0 %1703 }
0x13b0   :  { %v1709_v59 = vsel %vm165_vm2, %v1704_v55, 0 }
0x13b1   :  { %v1654_v52 = vpop.permute.xlu1 %1653 }
0x13b2   :  { %v1659_v56 = vsel %vm165_vm2, %v1654_v52, 0 }
0x13b3   :  { %v1702_v62 = vpop.permute.xlu0 %1701 }
0x13b5   :  { %v1652_v60 = vpop.permute.xlu1 %1651 }
0x13b6   :  { %v3342_v47 = vpop.eup %3341 }
0x13b7   :  { %v1551_v50 = vmul.f32 %v3342_v47, %v3338_v42 }
0x13b8   :  { %v3344_v51 = vpop.eup %3343 }
0x13b9   :  { %v1552_v53 = vmul.f32 %v3344_v51, %v3340_v61  ;;  %v1553_v54 = vpack.c.bf16 %v1551_v50, %v1551_v50 }
0x13bb   :  { %3109 = vmatmul.mubr.msk.bf16.vlgmr.msra.gmra.mrb[44].mxu1 %vm165_vm2, %v1553_v54  ;;  %v1554_v58 = vpack.c.bf16 %v1552_v53, %v1552_v53 }
0x13bc   :  { %3119 = vmatpush3.bf16.xpose.msra.mxu1 %v1659_v56  ;;  %3120 = vmatprep.mubr.msk.bf16.mxu1 %vm3506_vm0, %v3505_v0 }
0x13bd   :  { %3115 = vmatmul.mubr.msk.bf16.vlgmr.msra.gmra.mrb[48].mxu0 %vm165_vm2, %v1554_v58  ;;  %3130 = vmatprep.subr.bf16.mxu1 %v3505_v0 }
0x13be   :  { %3125 = vmatpush3.bf16.xpose.msra.mxu0 %v1709_v59  ;;  %3126 = vmatprep.mubr.msk.bf16.mxu0 %vm3506_vm0, %v3505_v0 }
0x13bf   :  { %3136 = vmatprep.subr.bf16.mxu0 %v3505_v0 }
0x13c3   :  { %3121 = vmatmul.mubr.msk.bf16.vlgmr.msra.gmra.mrb[48].mxu1 %vm165_vm2, %v1652_v60 }
0x13c4   :  { %3132 = vmatprep.mubr.msk.bf16.mxu1 %vm3506_vm0, %v3505_v0 }
0x13c5   :  { %3127 = vmatmul.mubr.msk.bf16.vlgmr.msra.gmra.mrb[52].mxu0 %vm165_vm2, %v1702_v62 }
0x13c6   :  { %3138 = vmatprep.mubr.msk.bf16.mxu0 %vm3506_vm0, %v3505_v0 }
0x148e   :  { %v3932_v63 = vpop.f32.mrb[44].mxu1 }
0x148f   :  { %v3110_v1 = vpop.f32.mrb[45].mxu1 }
0x1490   :  { %v1600_v2 = vpop.f32.mrb[46].mxu1  ;;  %v3934_v3 = vpop.f32.mrb[48].mxu0 }
0x1491   :  { %v3111_v11 = vpop.f32.mrb[47].mxu1  ;;  %v3116_v4 = vpop.f32.mrb[49].mxu0 }
0x1492   :  { %v1648_v44 = vpop.f32.mrb[50].mxu0 }
0x1493   :  { %v3117_v48 = vpop.f32.mrb[51].mxu0 }
0x1496   :  { %v1695_v49 = vpop.f32.mrb[48].mxu1 }
0x1497   :  { %v3122_v7 = vpop.f32.mrb[49].mxu1  ;;  %v1751_v8 = vsel %vm165_vm2, %v1695_v49, -inf }
0x1498   :  { %1752 = vmax.xlane.f32.xlu1 %v1751_v8  ;;  %v1698_v9 = vpop.f32.mrb[50].mxu1  ;;  %v1745_v10 = vpop.f32.mrb[52].mxu0 }
0x1499   :  { %v3123_v12 = vpop.f32.mrb[51].mxu1  ;;  %v3128_v13 = vpop.f32.mrb[53].mxu0  ;;  %v1754_v14 = vsel %vm165_vm2, %v1745_v10, -inf }
0x149a   :  { %1755 = vmax.xlane.f32.xlu0 %v1754_v14  ;;  %v1748_v16 = vpop.f32.mrb[54].mxu0 }
0x149b   :  { %v3129_v18 = vpop.f32.mrb[55].mxu0 }
0x14a9   :  { %1823 = vrot.lane.b32.xlu1 %v3878_v17, %s3510_s21 }
0x14b0   :  { %1775 = vrot.lane.b32.xlu0 %v3876_v15, %s3510_s21 }
0x1525   :  { %v1753_v19 = vpop.xlane.xlu1 %1752 }
0x1526   :  { %v1757_v20 = vsub.f32 %v1695_v49, %v1753_v19 }
0x1527   :  { %v1756_v21 = vpop.xlane.xlu0 %1755 }
0x1528   :  { %v1759_v22 = vmul.f32 1.442695, %v1757_v20  ;;  %v1758_v23 = vsub.f32 %v1745_v10, %v1756_v21 }
0x1529   :  { %v1824_v24 = vpop.permute.xlu1 %1823 }
0x152a   :  { %3345 = vpow2.f32 %v1759_v22  ;;  %v1761_v25 = vmul.f32 1.442695, %v1758_v23  ;;  %v1829_v26 = vsel %vm289_vm3, %v1824_v24, 0 }
0x152b   :  { %3137 = vmatpush3.bf16.msra.mxu0 %v1829_v26  ;;  %v1776_v27 = vpop.permute.xlu0 %1775 }
0x152c   :  { %3347 = vpow2.f32 %v1761_v25  ;;  %v1781_v28 = vsel %vm289_vm3, %v1776_v27, 0  ;;  %3148 = vmatprep.subr.bf16.mxu0 %v3505_v0 }
0x152d   :  { %3131 = vmatpush3.bf16.msra.mxu1 %v1781_v28 }
0x152e   :  { %3142 = vmatprep.subr.bf16.mxu1 %v3505_v0 }
0x1534   :  { %v3346_v29 = vpop.eup %3345 }
0x1535   :  { %v1763_v30 = vsel %vm165_vm2, %v3346_v29, 0.0 }
0x1536   :  { %v3348_v31 = vpop.eup %3347  ;;  %1764 = vadd.xlane.f32.xlu0 %v1763_v30 }
0x1537   :  { %v1766_v32 = vsel %vm165_vm2, %v3348_v31, 0.0 }
0x1538   :  { %1767 = vadd.xlane.f32.xlu1 %v1766_v32 }
0x1549   :  { %1873 = vrot.lane.b32.xlu1 %v3876_v15, %s3511_s20 }
0x154c   :  { %1923 = vrot.lane.b32.xlu0 %v3878_v17, %s3511_s20 }
0x154d   :  { %1871 = vrot.lane.b32.xlu1 %v3876_v15, %s3512_s22 }
0x1550   :  { %1921 = vrot.lane.b32.xlu0 %v3878_v17, %s3512_s22 }
0x15c3   :  { %v1765_v33 = vpop.xlane.xlu0 %1764 }
0x15c4   :  { %3349 = vrcp.f32 %v1765_v33 }
0x15c5   :  { %v1768_v34 = vpop.xlane.xlu1 %1767 }
0x15c6   :  { %3351 = vrcp.f32 %v1768_v34 }
0x15c7   :  { %v1924_v41 = vpop.permute.xlu0 %1923 }
0x15c8   :  { %v1929_v61 = vsel %vm165_vm2, %v1924_v41, 0 }
0x15c9   :  { %v1874_v38 = vpop.permute.xlu1 %1873 }
0x15ca   :  { %v1879_v42 = vsel %vm165_vm2, %v1874_v38, 0 }
0x15cb   :  { %v1922_v45 = vpop.permute.xlu0 %1921 }
0x15cd   :  { %v1872_v43 = vpop.permute.xlu1 %1871 }
0x15ce   :  { %v3350_v35 = vpop.eup %3349 }
0x15cf   :  { %v1771_v36 = vmul.f32 %v3350_v35, %v3346_v29 }
0x15d0   :  { %v3352_v37 = vpop.eup %3351 }
0x15d1   :  { %v1772_v39 = vmul.f32 %v3352_v37, %v3348_v31  ;;  %v1773_v40 = vpack.c.bf16 %v1771_v36, %v1771_v36 }
0x15d3   :  { %3133 = vmatmul.mubr.msk.bf16.vlgmr.msra.gmra.mrb[52].mxu1 %vm165_vm2, %v1773_v40  ;;  %v1774_v57 = vpack.c.bf16 %v1772_v39, %v1772_v39 }
0x15d4   :  { %3143 = vmatpush3.bf16.xpose.msra.mxu1 %v1879_v42  ;;  %3144 = vmatprep.mubr.msk.bf16.mxu1 %vm3506_vm0, %v3505_v0 }
0x15d5   :  { %3139 = vmatmul.mubr.msk.bf16.vlgmr.msra.gmra.mrb[56].mxu0 %vm165_vm2, %v1774_v57  ;;  %3154 = vmatprep.subr.bf16.mxu1 %v3505_v0 }
0x15d6   :  { %3149 = vmatpush3.bf16.xpose.msra.mxu0 %v1929_v61  ;;  %3150 = vmatprep.mubr.msk.bf16.mxu0 %vm3506_vm0, %v3505_v0 }
0x15d7   :  { %3160 = vmatprep.subr.bf16.mxu0 %v3505_v0 }
0x15db   :  { %3145 = vmatmul.mubr.msk.bf16.vlgmr.msra.gmra.mrb[56].mxu1 %vm165_vm2, %v1872_v43 }
0x15dc   :  { %3156 = vmatprep.mubr.msk.bf16.mxu1 %vm3506_vm0, %v3505_v0 }
0x15dd   :  { %3151 = vmatmul.mubr.msk.bf16.vlgmr.msra.gmra.mrb[60].mxu0 %vm165_vm2, %v1922_v45 }
0x15de   :  { %3162 = vmatprep.mubr.msk.bf16.mxu0 %vm3506_vm0, %v3505_v0 }
0x16a6   :  { %v3972_v46 = vpop.f32.mrb[52].mxu1 }
0x16a7   :  { %v3134_v47 = vpop.f32.mrb[53].mxu1 }
0x16a8   :  { %v1820_v50 = vpop.f32.mrb[54].mxu1  ;;  %v3974_v51 = vpop.f32.mrb[56].mxu0 }
0x16a9   :  { %v3262_v52 = vpack.i.bf16 %v3974_v51, %v3972_v46  ;;  %v3135_v53 = vpop.f32.mrb[55].mxu1  ;;  %v3140_v54 = vpop.f32.mrb[57].mxu0 }
0x16aa   :  { %v1868_v55 = vpop.f32.mrb[58].mxu0 }
0x16ab   :  { %v3141_v56 = vpop.f32.mrb[59].mxu0 }
0x16ae   :  { %v1915_v58 = vpop.f32.mrb[56].mxu1 }
0x16af   :  { %v3146_v59 = vpop.f32.mrb[57].mxu1  ;;  %v1971_v60 = vsel %vm165_vm2, %v1915_v58, -inf }
0x16b0   :  { %1972 = vmax.xlane.f32.xlu1 %v1971_v60  ;;  %v1918_v62 = vpop.f32.mrb[58].mxu1  ;;  %v1965_v1 = vpop.f32.mrb[60].mxu0 }
0x16b1   :  { %v3147_v2 = vpop.f32.mrb[59].mxu1  ;;  %v3152_v11 = vpop.f32.mrb[61].mxu0  ;;  %v1974_v4 = vsel %vm165_vm2, %v1965_v1, -inf }
0x16b2   :  { %1975 = vmax.xlane.f32.xlu0 %v1974_v4  ;;  %v1968_v44 = vpop.f32.mrb[62].mxu0 }
0x16b3   :  { %v3153_v48 = vpop.f32.mrb[63].mxu0 }
0x16c1   :  { %2043 = vrot.lane.b32.xlu1 %v3878_v17, %s3513_s23 }
0x16c8   :  { %1995 = vrot.lane.b32.xlu0 %v3876_v15, %s3513_s23 }
0x173d   :  { %v1973_v49 = vpop.xlane.xlu1 %1972 }
0x173e   :  { %v1977_v7 = vsub.f32 %v1915_v58, %v1973_v49 }
0x173f   :  { %v1976_v8 = vpop.xlane.xlu0 %1975 }
0x1740   :  { %v1979_v9 = vmul.f32 1.442695, %v1977_v7  ;;  %v1978_v10 = vsub.f32 %v1965_v1, %v1976_v8 }
0x1741   :  { %v2044_v12 = vpop.permute.xlu1 %2043 }
0x1742   :  { %3353 = vpow2.f32 %v1979_v9  ;;  %v1981_v13 = vmul.f32 1.442695, %v1978_v10  ;;  %v2049_v14 = vsel %vm289_vm3, %v2044_v12, 0 }
0x1743   :  { %3161 = vmatpush3.bf16.msra.mxu0 %v2049_v14  ;;  %v1996_v16 = vpop.permute.xlu0 %1995 }
0x1744   :  { %3355 = vpow2.f32 %v1981_v13  ;;  %v2001_v18 = vsel %vm289_vm3, %v1996_v16, 0  ;;  %3172 = vmatprep.subr.bf16.mxu0 %v3505_v0 }
0x1745   :  { %3155 = vmatpush3.bf16.msra.mxu1 %v2001_v18 }
0x1746   :  { %3166 = vmatprep.subr.bf16.mxu1 %v3505_v0 }
0x174c   :  { %v3354_v19 = vpop.eup %3353 }
0x174d   :  { %v1983_v20 = vsel %vm165_vm2, %v3354_v19, 0.0 }
0x174e   :  { %v3356_v21 = vpop.eup %3355  ;;  %1984 = vadd.xlane.f32.xlu0 %v1983_v20  ;;  %v3290_v20 = vld [vmem:[#allocation7 + $0x18] sm:$0xff]  }
0x174f   :  { %v1986_v22 = vsel %vm165_vm2, %v3356_v21, 0.0 }
0x1750   :  { %1987 = vadd.xlane.f32.xlu1 %v1986_v22 }
0x1761   :  { %2093 = vrot.lane.b32.xlu1 %v3876_v15, %s3514_s24 }
0x1764   :  { %2143 = vrot.lane.b32.xlu0 %v3878_v17, %s3514_s24 }
0x1765   :  { %2091 = vrot.lane.b32.xlu1 %v3876_v15, %s3515_s25 }
0x1768   :  { %2141 = vrot.lane.b32.xlu0 %v3878_v17, %s3515_s25 }
0x17db   :  { %v1985_v23 = vpop.xlane.xlu0 %1984 }
0x17dc   :  { %3357 = vrcp.f32 %v1985_v23 }
0x17dd   :  { %v1988_v24 = vpop.xlane.xlu1 %1987 }
0x17de   :  { %3359 = vrcp.f32 %v1988_v24 }
0x17df   :  { %v2144_v31 = vpop.permute.xlu0 %2143 }
0x17e0   :  { %v2149_v34 = vsel %vm165_vm2, %v2144_v31, 0 }
0x17e1   :  { %v2094_v28 = vpop.permute.xlu1 %2093 }
0x17e2   :  { %v2099_v32 = vsel %vm165_vm2, %v2094_v28, 0 }
0x17e3   :  { %v2142_v36 = vpop.permute.xlu0 %2141 }
0x17e5   :  { %v2092_v35 = vpop.permute.xlu1 %2091 }
0x17e6   :  { %v3358_v25 = vpop.eup %3357 }
0x17e7   :  { %v1991_v26 = vmul.f32 %v3358_v25, %v3354_v19  ;;  %v3289_v19 = vld [vmem:[#allocation7 + $0x10] sm:$0xff]  }
0x17e8   :  { %v3360_v27 = vpop.eup %3359 }
0x17e9   :  { %v1992_v29 = vmul.f32 %v3360_v27, %v3356_v21  ;;  %v1993_v30 = vpack.c.bf16 %v1991_v26, %v1991_v26 }
0x17eb   :  { %3157 = vmatmul.mubr.msk.bf16.vlgmr.msra.gmra.mrb[60].mxu1 %vm165_vm2, %v1993_v30  ;;  %v1994_v33 = vpack.c.bf16 %v1992_v29, %v1992_v29 }
0x17ec   :  { %3167 = vmatpush3.bf16.xpose.msra.mxu1 %v2099_v32  ;;  %3168 = vmatprep.mubr.msk.bf16.mxu1 %vm3506_vm0, %v3505_v0 }
0x17ed   :  { %3163 = vmatmul.mubr.msk.bf16.vlgmr.msra.gmra.mrb[64].mxu0 %vm165_vm2, %v1994_v33  ;;  %3178 = vmatprep.subr.bf16.mxu1 %v3505_v0 }
0x17ee   :  { %3173 = vmatpush3.bf16.xpose.msra.mxu0 %v2149_v34  ;;  %3174 = vmatprep.mubr.msk.bf16.mxu0 %vm3506_vm0, %v3505_v0 }
0x17ef   :  { %3184 = vmatprep.subr.bf16.mxu0 %v3505_v0 }
0x17f3   :  { %3169 = vmatmul.mubr.msk.bf16.vlgmr.msra.gmra.mrb[64].mxu1 %vm165_vm2, %v2092_v35 }
0x17f4   :  { %3180 = vmatprep.mubr.msk.bf16.mxu1 %vm3506_vm0, %v3505_v0 }
0x17f5   :  { %3175 = vmatmul.mubr.msk.bf16.vlgmr.msra.gmra.mrb[68].mxu0 %vm165_vm2, %v2142_v36 }
0x17f6   :  { %3186 = vmatprep.mubr.msk.bf16.mxu0 %vm3506_vm0, %v3505_v0 }
0x18be   :  { %v2037_v37 = vpop.f32.mrb[60].mxu1 }
0x18bf   :  { %v3158_v38 = vpop.f32.mrb[61].mxu1 }
0x18c0   :  { %v2040_v39 = vpop.f32.mrb[62].mxu1  ;;  %v2085_v40 = vpop.f32.mrb[64].mxu0 }
0x18c1   :  { %v3267_v41 = vpack.i.bf16 %v2085_v40, %v2037_v37  ;;  %v3159_v42 = vpop.f32.mrb[63].mxu1  ;;  %v3164_v57 = vpop.f32.mrb[65].mxu0 }
0x18c2   :  { %v2088_v61 = vpop.f32.mrb[66].mxu0 }
0x18c3   :  { %v3165_v43 = vpop.f32.mrb[67].mxu0 }
0x18c6   :  { %v2135_v45 = vpop.f32.mrb[64].mxu1 }
0x18c7   :  { %v3170_v47 = vpop.f32.mrb[65].mxu1  ;;  %v2191_v50 = vsel %vm165_vm2, %v2135_v45, -inf }
0x18c8   :  { %2192 = vmax.xlane.f32.xlu1 %v2191_v50  ;;  %v2138_v53 = vpop.f32.mrb[66].mxu1  ;;  %v2185_v54 = vpop.f32.mrb[68].mxu0 }
0x18c9   :  { %v3171_v55 = vpop.f32.mrb[67].mxu1  ;;  %v3176_v56 = vpop.f32.mrb[69].mxu0  ;;  %v2194_v58 = vsel %vm165_vm2, %v2185_v54, -inf }
0x18ca   :  { %2195 = vmax.xlane.f32.xlu0 %v2194_v58  ;;  %v2188_v59 = vpop.f32.mrb[70].mxu0 }
0x18cb   :  { %v3177_v60 = vpop.f32.mrb[71].mxu0 }
0x1955   :  { %v2193_v62 = vpop.xlane.xlu1 %2192 }
0x1956   :  { %v2197_v1 = vsub.f32 %v2135_v45, %v2193_v62 }
0x1957   :  { %v2196_v2 = vpop.xlane.xlu0 %2195 }
0x1958   :  { %v2199_v11 = vmul.f32 1.442695, %v2197_v1  ;;  %v2198_v4 = vsub.f32 %v2185_v54, %v2196_v2 }
0x195a   :  { %3361 = vpow2.f32 %v2199_v11  ;;  %v2201_v44 = vmul.f32 1.442695, %v2198_v4 }
0x195c   :  { %3363 = vpow2.f32 %v2201_v44 }
0x1964   :  { %v3362_v48 = vpop.eup %3361 }
0x1965   :  { %v2203_v49 = vsel %vm165_vm2, %v3362_v48, 0.0 }
0x1966   :  { %v3364_v7 = vpop.eup %3363  ;;  %2204 = vadd.xlane.f32.xlu0 %v2203_v49 }
0x1967   :  { %v2206_v8 = vsel %vm165_vm2, %v3364_v7, 0.0 }
0x1968   :  { %2207 = vadd.xlane.f32.xlu1 %v2206_v8 }
0x1979   :  { %2263 = vrot.lane.b32.xlu1 %v3878_v17, %s3516_s26 }
0x197c   :  { %2215 = vrot.lane.b32.xlu0 %v3876_v15, %s3516_s26 }
0x197d   :  { %3263 = vrot.lane.b32.xlu1 %v3262_v52, %s3500_s28 }
0x1980   :  { %3268 = vrot.lane.b32.xlu0 %v3267_v41, %s3496_s15 }
0x19f3   :  { %v2205_v9 = vpop.xlane.xlu0 %2204 }
0x19f4   :  { %3365 = vrcp.f32 %v2205_v9 }
0x19f5   :  { %v2208_v10 = vpop.xlane.xlu1 %2207 }
0x19f6   :  { %3367 = vrcp.f32 %v2208_v10 }
0x19f7   :  { %v2216_v12 = vpop.permute.xlu0 %2215 }
0x19f8   :  { %v2221_v13 = vsel %vm289_vm3, %v2216_v12, 0 }
0x19f9   :  { %v2264_v14 = vpop.permute.xlu1 %2263  ;;  %3179 = vmatpush3.bf16.msra.mxu1 %v2221_v13 }
0x19fa   :  { %v2269_v17 = vsel %vm289_vm3, %v2264_v14, 0  ;;  %3190 = vmatprep.subr.bf16.mxu1 %v3505_v0 }
0x19fb   :  { %3185 = vmatpush3.bf16.msra.mxu0 %v2269_v17  ;;  %v3269_v33 = vpop.permute.xlu0 %3268 }
0x19fc   :  { %3198 = vmatprep.subr.bf16.mxu0 %v3505_v0  ;;  %v3271_v36 = vunpack.i.h.bf16 %v3269_v33  ;;  %v3270_v37 = vunpack.i.l.bf16 %v3269_v33 }
0x19fd   :  { %v3264_v30 = vpop.permute.xlu1 %3263 }
0x19fe   :  { %v3366_v15 = vpop.eup %3365  ;;  %v3266_v31 = vunpack.i.h.bf16 %v3264_v30  ;;  %v3265_v32 = vunpack.i.l.bf16 %v3264_v30 }
0x19ff   :  { %v2211_v46 = vmul.f32 %v3366_v15, %v3362_v48 }
0x1a00   :  { %v3368_v51 = vpop.eup %3367  ;;  %v2336_v34 = vsel %vm165_vm2, %v3934_v3, %v3266_v31  ;;  %v2335_v35 = vsel %vm165_vm2, %v3932_v63, %v3265_v32  ;;  %v2836_v63 = vld [vmem:[%s4125_s5 + $0x8] ss:$0 sm:$0xff] }
0x1a01   :  { %v2212_v52 = vmul.f32 %v3368_v51, %v3364_v7  ;;  %v2213_v16 = vpack.c.bf16 %v2211_v46, %v2211_v46  ;;  %v2337_v41 = vsel %vm1067_vm4, %v2335_v35, %v3270_v37  ;;  %v2338_v42 = vsel %vm1067_vm4, %v2336_v34, %v3271_v36  ;;  %v3292_v7 = vld [vmem:[#allocation8 + $0x28] sm:$0xff]   ;;  %v2842_v46 = vld [vmem:[%s4125_s5 + $0x9] ss:$0 sm:$0xff]  ;;  %v2850_v35 = vld [vmem:[%s4125_s5 + $0xc] ss:$0 sm:$0xff] }
0x1a03   :  { %3181 = vmatmul.mubr.msk.bf16.vlgmr.msra.gmra.mrb[68].mxu1 %vm165_vm2, %v2213_v16  ;;  %v2214_v18 = vpack.c.bf16 %v2212_v52, %v2212_v52 }
0x1a04   :  { %3194 = vmatprep.mubr.msk.bf16.mxu1 %vm3506_vm0, %v3505_v0  ;;  %3191 = vmatpush3.bf16.msra.mxu1 %v3289_v19 }
0x1a05   :  { %3187 = vmatmul.mubr.msk.bf16.vlgmr.msra.gmra.mrb[72].mxu0 %vm165_vm2, %v2214_v18  ;;  %3192 = vmatprep.subr.bf16.mxu1 %v3505_v0  ;;  %v2843_v18 = vld [vmem:[%s4125_s5 + $0xa] ss:$0 sm:$0xff] }
0x1a06   :  { %3202 = vmatprep.mubr.msk.bf16.mxu0 %vm3506_vm0, %v3505_v0 }
0x1a08   :  { %3193 = vmatpush3.bf16.msra.mxu1 %v3290_v20 }
0x1a09   :  { %3206 = vmatprep.subr.bf16.mxu1 %v3505_v0 }
0x1ad6   :  { %v2257_v21 = vpop.f32.mrb[68].mxu1 }
0x1ad7   :  { %v3182_v22 = vpop.f32.mrb[69].mxu1 }
0x1ad8   :  { %v2260_v23 = vpop.f32.mrb[70].mxu1  ;;  %v2305_v24 = vpop.f32.mrb[72].mxu0 }
0x1ad9   :  { %v3272_v25 = vpack.i.bf16 %v2305_v24, %v2257_v21  ;;  %v3183_v26 = vpop.f32.mrb[71].mxu1  ;;  %v3188_v27 = vpop.f32.mrb[73].mxu0  ;;  %v3293_v23 = vld [vmem:[#allocation8 + $0x30] sm:$0xff]   ;;  %v3294_v24 = vld [vmem:[#allocation8 + $0x38] sm:$0xff]  }
0x1ada   :  { %v2308_v28 = vpop.f32.mrb[74].mxu0 }
0x1adb   :  { %3273 = vrot.lane.b32.xlu1 %v3272_v25, %s3517_s27  ;;  %v3189_v29 = vpop.f32.mrb[75].mxu0  ;;  %v2845_v25 = vld [vmem:[%s4125_s5 + $0xb] ss:$0 sm:$0xff] }
0x1b4d   :  { %v3274_v38 = vpop.permute.xlu1 %3273 }
0x1b4e   :  { %v3276_v39 = vunpack.i.h.bf16 %v3274_v38  ;;  %v3275_v40 = vunpack.i.l.bf16 %v3274_v38 }
0x1b50   :  { %v2340_v57 = vsel %vm1070_vm5, %v2338_v42, %v3276_v39  ;;  %v2339_v61 = vsel %vm1070_vm5, %v2337_v41, %v3275_v40 }
0x1b51   :  { %v2341_v43 = vpack.c.bf16 %v2340_v57, %v2339_v61 }
0x1b53   :  { %3195 = vmatmul.mubr.msk.bf16.vlgmr.msra.gmra.mrb[72].mxu1 %vm112_vm1, %v2341_v43 }
0x1b54   :  { %3210 = vmatprep.mubr.msk.bf16.mxu1 %vm3506_vm0, %v3505_v0  ;;  %3207 = vmatpush3.bf16.msra.mxu1 %v3293_v23 }
0x1b55   :  { %3208 = vmatprep.subr.bf16.mxu1 %v3505_v0 }
0x1b58   :  { %3209 = vmatpush3.bf16.msra.mxu1 %v3294_v24 }
0x1c26   :  { %v2402_v3 = vpop.f32.mrb[72].mxu1 }
0x1c27   :  { %v2403_v45 = vadd.f32 %v2836_v63, %v2402_v3  ;;  %v3196_v47 = vpop.f32.mrb[73].mxu1 }
0x1c28   :  { %v2405_v50 = vpop.f32.mrb[74].mxu1 }
0x1c29   :  { %v2406_v53 = vadd.f32 %v2836_v63, %v2405_v50  ;;  %v3197_v54 = vpop.f32.mrb[75].mxu1  ;;  %v2409_v55 = vadd.f32 %v2403_v45, %v3867_v5 }
0x1c2b   :  { %v2410_v56 = vadd.f32 %v2406_v53, %v3869_v6  ;;  %v2413_v58 = vsel %vm112_vm1, %v2409_v55, 0.0  ;;  %v3291_v6 = vld [vmem:[#allocation8 + $0x20] sm:$0xff]  }
0x1c2c   :  { %2414 = vadd.xlane.f32.xlu0 %v2413_v58  ;;  %3199 = vmatpush3.bf16.msra.mxu0 %v3291_v6 }
0x1c2d   :  { %v2416_v59 = vsel %vm112_vm1, %v2410_v56, 0.0  ;;  %3200 = vmatprep.subr.bf16.mxu0 %v3505_v0 }
0x1c2e   :  { %2417 = vadd.xlane.f32.xlu1 %v2416_v59  ;;  %v3295_v59 = vld [vmem:[%s4126_s6] sm:$0xff]  }
0x1c30   :  { %3201 = vmatpush3.bf16.msra.mxu0 %v3292_v7 }
0x1c31   :  { %3214 = vmatprep.subr.bf16.mxu0 %v3505_v0 }
0x1cb9   :  { %v2415_v60 = vpop.xlane.xlu0 %2414 }
0x1cba   :  { %v2419_v62 = vmul.f32 0.03125, %v2415_v60  ;;  %v3296_v60 = vld [vmem:[%s4126_s6 + $0x8] sm:$0xff]  }
0x1cbb   :  { %v2418_v1 = vpop.xlane.xlu1 %2417 }
0x1cbc   :  { %v2421_v2 = vsub.f32 %v2409_v55, %v2419_v62  ;;  %v2420_v11 = vmul.f32 0.03125, %v2418_v1 }
0x1cbe   :  { %v2422_v4 = vsub.f32 %v2410_v56, %v2420_v11  ;;  %v2423_v44 = vmul.f32 %v2421_v2, %v2421_v2 }
0x1cc0   :  { %v2425_v48 = vsel %vm112_vm1, %v2423_v44, 0.0  ;;  %v2424_v49 = vmul.f32 %v2422_v4, %v2422_v4 }
0x1cc1   :  { %2426 = vadd.xlane.f32.xlu0 %v2425_v48 }
0x1cc2   :  { %v2428_v5 = vsel %vm112_vm1, %v2424_v49, 0.0  ;;  %v2856_v49 = vld [vmem:[%s4125_s5 + $0xd] ss:$0 sm:$0xff] }
0x1cc5   :  { %2429 = vadd.xlane.f32.xlu0 %v2428_v5 }
0x1d4e   :  { %v2427_v8 = vpop.xlane.xlu0 %2426 }
0x1d4f   :  { %v2431_v9 = vmul.f32 0.03125, %v2427_v8 }
0x1d51   :  { %v2433_v10 = vadd.f32 1e-05, %v2431_v9 }
0x1d52   :  { %v2430_v12 = vpop.xlane.xlu0 %2429 }
0x1d53   :  { %3369 = vrsqrt.f32 %v2433_v10  ;;  %v2432_v13 = vmul.f32 0.03125, %v2430_v12 }
0x1d55   :  { %v2434_v14 = vadd.f32 1e-05, %v2432_v13 }
0x1d57   :  { %3371 = vrsqrt.f32 %v2434_v14 }
0x1d5d   :  { %v3370_v17 = vpop.eup %3369 }
0x1d5e   :  { %v2437_v15 = vmul.f32 %v3370_v17, %v2421_v2 }
0x1d60   :  { %v2443_v52 = vmul.f32 %v2842_v46, %v2437_v15 }
0x1d61   :  { %v3372_v51 = vpop.eup %3371 }
0x1d62   :  { %v2438_v16 = vmul.f32 %v3372_v51, %v2422_v4  ;;  %v2449_v20 = vadd.f32 %v2843_v18, %v2443_v52 }
0x1d64   :  { %v2444_v19 = vmul.f32 %v2842_v46, %v2438_v16 }
0x1d66   :  { %v2450_v21 = vadd.f32 %v2843_v18, %v2444_v19 }
0x1d68   :  { %v2451_v22 = vpack.c.bf16 %v2450_v21, %v2449_v20 }
0x1d6a   :  { %3203 = vmatmul.mubr.msk.bf16.vlgmr.msra.gmra.mrb[76].mxu0 %vm112_vm1, %v2451_v22 }
0x1d6b   :  { %3218 = vmatprep.mubr.msk.bf16.mxu0 %vm3506_vm0, %v3505_v0  ;;  %3215 = vmatpush3.bf16.msra.mxu0 %v3295_v59 }
0x1d6c   :  { %3216 = vmatprep.subr.bf16.mxu0 %v3505_v0  ;;  %v2857_v0 = vld [vmem:[%s4125_s5 + $0xe] ss:$0 sm:$0xff] }
0x1d6f   :  { %3217 = vmatpush3.bf16.msra.mxu0 %v3296_v60 }
0x1e3d   :  { %v2511_v26 = vpop.f32.mrb[76].mxu0 }
0x1e3e   :  { %v2512_v27 = vadd.f32 %v2845_v25, %v2511_v26  ;;  %v3204_v28 = vpop.f32.mrb[77].mxu0 }
0x1e3f   :  { %v2514_v29 = vpop.f32.mrb[78].mxu0 }
0x1e40   :  { %v2515_v30 = vadd.f32 %v2845_v25, %v2514_v29  ;;  %v3205_v31 = vpop.f32.mrb[79].mxu0  ;;  %v2518_v32 = vmax.f32 %v2512_v27, 0.0 }
0x1e42   :  { %v2519_v33 = vmax.f32 %v2515_v30, 0.0 }
0x1e44   :  { %v2520_v34 = vpack.c.bf16 %v2519_v33, %v2518_v32  ;;  %v2730_v32 = vld [vmem:[%s4127_s7 + $0x2] sm:$0x1]  ;;  %v3518_v33 = vmov 0  }
0x1e45   :  { %3277 = vset.pattern.permute.xlu0 %v3518_v33  ;;  %3278 = vset.pattern.permute.xlu1 %v3518_v33 }
0x1e46   :  { %3211 = vmatmul.mubr.msk.bf16.vlgmr.msra.gmra.mrb[76].mxu1 %vm112_vm1, %v2520_v34  ;;  %v2858_v34 = vld [vmem:[%s4127_s7] ss:$0 sm:$0xff] }
0x1f19   :  { %v2580_v36 = vpop.f32.mrb[76].mxu1 }
0x1f1a   :  { %v2581_v37 = vadd.f32 %v2850_v35, %v2580_v36  ;;  %v3212_v38 = vpop.f32.mrb[77].mxu1 }
0x1f1b   :  { %v2583_v39 = vpop.f32.mrb[78].mxu1  ;;  %v2862_v38 = vld [vmem:[%s4127_s7 + $0x1] ss:$0 sm:$0xff]  ;;  %s3465_s7 = scalar_lea.vmem %s2761_s30, 16 }
0x1f1c   :  { %v2587_v40 = vadd.f32 %v2581_v37, %v2449_v20  ;;  %v2584_v41 = vadd.f32 %v2850_v35, %v2583_v39  ;;  %v3213_v42 = vpop.f32.mrb[79].mxu1  ;;  %p3466_p4 = scmp.ne.s32.totalorder %s2761_s30, %s3465_s7  ;;  %p3471_p6 = scmp.lt.s32.totalorder %s3469_s9, %s3465_s7 }
0x1f1e   :  { %v2591_v57 = vsel %vm112_vm1, %v2587_v40, 0.0  ;;  %v2588_v61 = vadd.f32 %v2584_v41, %v2450_v21  ;;  %p3472_p7 = por %p3471_p6, %p3470_p5 }
0x1f1f   :  { %2592 = vadd.xlane.f32.xlu1 %v2591_v57 }
0x1f20   :  { %v2594_v43 = vsel %vm112_vm1, %v2588_v61, 0.0  ;;  %p3473_p8 = pnand %p3472_p7, %p3466_p4 }
0x1f21   :  { %2595 = vadd.xlane.f32.xlu0 %v2594_v43 }
0x1fac   :  { %v2593_v63 = vpop.xlane.xlu1 %2592 }
0x1fad   :  { %v2597_v3 = vmul.f32 0.03125, %v2593_v63 }
0x1fae   :  { %v2596_v45 = vpop.xlane.xlu0 %2595 }
0x1faf   :  { %v2599_v47 = vsub.f32 %v2587_v40, %v2597_v3  ;;  %v2598_v50 = vmul.f32 0.03125, %v2596_v45 }
0x1fb1   :  { %v2600_v53 = vsub.f32 %v2588_v61, %v2598_v50  ;;  %v2601_v54 = vmul.f32 %v2599_v47, %v2599_v47  ;;  %v2735_v61 = vlaneseq }
0x1fb3   :  { %v2603_v55 = vsel %vm112_vm1, %v2601_v54, 0.0  ;;  %v2602_v56 = vmul.f32 %v2600_v53, %v2600_v53  ;;  %v2736_v43 = vshrl.u32 %v2735_v61, 7 }
0x1fb4   :  { %2604 = vadd.xlane.f32.xlu1 %v2603_v55 }
0x1fb5   :  { %v2606_v58 = vsel %vm112_vm1, %v2602_v56, 0.0  ;;  %v2737_v63 = vsub.s32 0, %v2736_v43 }
0x1fb6   :  { %2607 = vadd.xlane.f32.xlu0 %v2606_v58 }
0x1fcc   :  { %2733 = vperm.xlu0 %3277, %v2730_v32  }
0x2041   :  { %v2605_v62 = vpop.xlane.xlu1 %2604 }
0x2042   :  { %v2609_v1 = vmul.f32 0.03125, %v2605_v62 }
0x2043   :  { %v2608_v2 = vpop.xlane.xlu0 %2607 }
0x2044   :  { %v2611_v11 = vadd.f32 1e-05, %v2609_v1  ;;  %v2610_v4 = vmul.f32 0.03125, %v2608_v2 }
0x2046   :  { %3373 = vrsqrt.f32 %v2611_v11  ;;  %v2612_v44 = vadd.f32 1e-05, %v2610_v4 }
0x2048   :  { %3375 = vrsqrt.f32 %v2612_v44 }
0x204b   :  { %v2734_v3 = vpop.permute.xlu0 %2733 }
0x204c   :  { %v2738_v45 = vrot.slane %v2734_v3, %v2737_v63 }
0x2050   :  { %v3374_v48 = vpop.eup %3373 }
0x2051   :  { %v2615_v5 = vmul.f32 %v3374_v48, %v2599_v47 }
0x2052   :  { %v3376_v6 = vpop.eup %3375 }
0x2053   :  { %v2621_v7 = vmul.f32 %v2856_v49, %v2615_v5  ;;  %v2616_v8 = vmul.f32 %v3376_v6, %v2600_v53  ;;  %v2746_v53 = vand.u32 127, %v2735_v61 }
0x2055   :  { %v2627_v9 = vadd.f32 %v2857_v0, %v2621_v7  ;;  %v2622_v10 = vmul.f32 %v2856_v49, %v2616_v8  ;;  %v2749_v54 = vsub.s32 %v2746_v53, %v2736_v43 }
0x2057   :  { %v2629_v12 = vsel %vm112_vm1, %v2627_v9, 0.0  ;;  %v2628_v13 = vadd.f32 %v2857_v0, %v2622_v10 }
0x2058   :  { %v2630_v14 = vrot.slane %v2629_v12, 4 }
0x2059   :  { %v2636_v17 = vsel %vm112_vm1, %v2628_v13, 0.0 }
0x205a   :  { %v2631_v15 = vadd.f32 %v2630_v14, %v2629_v12  ;;  %v2637_v46 = vrot.slane %v2636_v17, 4 }
0x205c   :  { %v2632_v51 = vrot.slane %v2631_v15, 2  ;;  %v2638_v52 = vadd.f32 %v2637_v46, %v2636_v17 }
0x205e   :  { %v2639_v16 = vrot.slane %v2638_v52, 2  ;;  %v2633_v18 = vadd.f32 %v2632_v51, %v2631_v15 }
0x2060   :  { %v2634_v19 = vrot.slane %v2633_v18, 1  ;;  %v2640_v20 = vadd.f32 %v2639_v16, %v2638_v52 }
0x2062   :  { %v2635_v21 = vadd.f32 %v2634_v19, %v2633_v18  ;;  %v2641_v22 = vrot.slane %v2640_v20, 1 }
0x2064   :  { %v2642_v23 = vadd.f32 %v2641_v22, %v2640_v20  ;;  %v2644_v24 = vmul.f32 0.125, %v2635_v21 }
0x2066   :  { %v2645_v25 = vmul.f32 0.125, %v2642_v23  ;;  %v2646_v26 = vpack.c.bf16 %v2644_v24, %v2644_v24 }
0x2068   :  { %v2647_v27 = vpack.c.bf16 %v2645_v25, %v2645_v25  ;;  %v2659_v28 = vunpack.c.l.b16 %v2646_v26 }
0x206a   :  { %v2660_v29 = vunpack.c.l.b16 %v2647_v27 }
0x206c   :  { %v2662_v30 = vsel %vm2661_vm6, %v2660_v29, %v2659_v28 }
0x206d   :  { %v2663_v31 = vpack.c.b16 %v2662_v30, %v2662_v30 }
0x206f   :  { %3219 = vmatmul.mubr.msk.bf16.vlgmr.msra.gmra.mrb[80].mxu0 %vm112_vm1, %v2663_v31 }
0x2142   :  { %v2713_v35 = vpop.f32.mrb[80].mxu0 }
0x2143   :  { %v2714_v36 = vadd.f32 %v2858_v34, %v2713_v35  ;;  %v3220_v37 = vpop.f32.mrb[81].mxu0 }
0x2144   :  { %v2716_v39 = vpop.f32.mrb[82].mxu0 }
0x2145   :  { %v2719_v40 = vmax.f32 %v2714_v36, 0.0  ;;  %v3221_v41 = vpop.f32.mrb[83].mxu0 }
0x2147   :  { %v2725_v42 = vmul.f32 %v2862_v38, %v2719_v40 }
0x2149   :  { %v2727_v57 = vsel %vm2726_vm7, %v2725_v42, 0.0 }
0x214a   :  { %2728 = vadd.xlane.f32.xlu1 %v2727_v57 }
0x21d7   :  { %v2729_v47 = vpop.xlane.xlu1 %2728 }
0x21d8   :  { %v2740_v50 = vadd.f32 %v2738_v45, %v2729_v47 }
0x21da   :  { %2743 = vperm.xlu1 %3278, %v2740_v50  }
0x2259   :  { %v2744_v55 = vpop.permute.xlu1 %2743 }
0x225a   :  { %v2750_v56 = vrot.slane %v2744_v55, %v2749_v54 }
0x225c   :  { %2753 = vst.msk [vmem:[#allocation10] sm:$0x1] %vm2752_vm8, %v2750_v56 }
0x225d   :  { %3476 = shalt.err (!%p3473_p8)
}
0x225e   :  { %s3477_s15 = scalar_lea.hbm %s4128_s8, 16 }
0x225f   :  { %p3478_p9 = scmp.ne.s32.totalorder %s4128_s8, %s3477_s15  ;;  %p3481_p10 = scmp.lt.u32.totalorder %s3477_s15, %s4128_s8 }
0x2261   :  { %p3483_p11 = pnand %p3481_p10, %p3478_p9 }
0x2263   :  { %3486 = shalt.err (!%p3483_p11)
}
0x2264   :  { %2763 = dma.vmem_to_hbm [thread:$0]  %s2761_s30, 16, %s4128_s8, [#allocation4]  }
0x2265   :  { %3493 = dma.done.wait [#allocation4], 16  }
0x2266   :  { %3494 = vsyncadd [#allocation4], 4294967280 }
0x2267   :  { %2767 = vsyncpa [#allocation3], 1 }
0x2268   :  { %2768 = vsyncpa [#allocation6], 1 }
0x2269   :  { %2769 = vsyncpa [#allocation9], 1 }
0x226a   :  { %2770 = vsyncpa [#allocation4], 1 }

</bundles_post_ra>
